<compile_context>
chip_gen: v6e
topology: v6e:2x2x1
jax: 0.10.0
libtpu: 0.0.40
codegen_flags: <defaults>
</compile_context>

<pallas_src>
import functools

import jax
import jax.numpy as jnp
from jax import lax
from jax.experimental import pallas as pl
from jax.experimental.pallas import tpu as pltpu

_LANES = 128


def _vmem_capacity_bytes():
    try:
        info = pltpu.get_tpu_info()
        cap = getattr(info, "vmem_capacity_bytes", None)
        if cap:
            return int(cap)
    except Exception:
        pass
    return 64 * 1024 * 1024  # conservative: v7x per-TensorCore VMEM


def _block_bytes(tb, ci, co, ts):
    """Bytes of one (x, w, o) block triple (float32, single-buffered)."""
    lane_b = ts * _LANES * 4
    x = 2 * ci * tb * lane_b
    w = 2 * co * ci * lane_b
    o = 2 * co * tb * lane_b
    return x + w + o


def _plan_tiles(B, Ci, Co, S):
    """Pick (tb, ts, s_pad): batch block, mode-sublane block, padded mode rows.

    Constraints / preferences:
      * ts multiple of 8 whenever S allows (full (8,128) vregs); otherwise the
        full extent (legal per the BlockSpec rule).
      * Minimal mode padding first, then the largest tile.
      * tb as large as possible (weight block streamed B/tb times), but
        tb*ts <= 64 sublane rows so per-o accumulators stay vreg-resident.
      * >= 2 total grid steps when B >= 2 (v7x has two TensorCores).
      * Double-buffered blocks fit a per-generation VMEM budget.
    """
    cap = _vmem_capacity_bytes()
    budget = int(0.55 * cap)                      # headroom for scratch

    if S >= 5:
        ts_cands = sorted((8, 16, 32, 64),
                          key=lambda t: (-(-S // t) * t, -t))
    else:
        ts_cands = [S]                            # tiny problem: full extent

    div_B = [d for d in range(B, 0, -1) if B % d == 0]
    for tb in div_B:
        for ts in ts_cands:
            if tb * ts > 64:
                continue
            s_pad = -(-S // ts) * ts
            steps = (B // tb) * (s_pad // ts)
            if B >= 2 and steps < 2:
                continue
            if 2 * _block_bytes(tb, Ci, Co, ts) > budget:
                continue
            return tb, ts, s_pad
    # Fallback: smallest legal tiles (extreme channel counts would need a
    # Ci/Co grid axis on top of this; not needed for this module's sizes).
    ts = ts_cands[-1]
    return 1, ts, -(-S // ts) * ts


def _compl_mul_kernel(x_ref, w_ref, o_ref):
    """One grid step = (one mode sublane-row block) x (one batch block).

    x_ref : (2, Ci, tb, ts, 128)  packed [real, imag] of x_ft
    w_ref : (2, Co, Ci, ts, 128)  packed [real, imag] of the weights
    o_ref : (2, Co, tb, ts, 128)  packed [real, imag] of out_ft
    out[o, b, s, l] = sum_i x[i, b, s, l] * w[o, i, s, l]   (complex per mode)
    """
    Ci = x_ref.shape[1]
    Co = w_ref.shape[1]
    tb, ts, L = x_ref.shape[2], x_ref.shape[3], x_ref.shape[4]

    def mul_acc(i, o, acc_r, acc_i):
        # Slice straight from the refs: keeps the live set to a few vregs
        # (no whole-block temporaries) and loads on the vld slots.
        xr = x_ref[0, i]                  # (tb, ts, 128)
        xi = x_ref[1, i]
        wr = w_ref[0, o, i]               # (ts, 128), broadcast over tb
        wi = w_ref[1, o, i]
        # 3-multiply complex product:
        #   k1 = wr*(xr+xi); k2 = xr*(wi-wr); k3 = xi*(wr+wi)
        #   real += k1 - k3;  imag += k1 + k2
        k1 = wr * (xr + xi)
        k2 = xr * (wi - wr)
        k3 = xi * (wr + wi)
        return acc_r + (k1 - k3), acc_i + (k1 + k2)

    for o in range(Co):                   # static; Co is small for this module
        zero = jnp.zeros((tb, ts, L), jnp.float32)
        if Ci <= 8:
            acc_r, acc_i = zero, zero
            for i in range(Ci):           # tiny & static -> fully unrolled
                acc_r, acc_i = mul_acc(i, o, acc_r, acc_i)
        else:
            # Partial unroll bounds live ranges / code size at large Ci.
            def body(i, carry, _o=o):
                return mul_acc(i, _o, *carry)
            acc_r, acc_i = lax.fori_loop(0, Ci, body, (zero, zero), unroll=4)
        # Single lane-dense store per accumulator; accumulation stayed in vregs.
        o_ref[0, o] = acc_r
        o_ref[1, o] = acc_i


def _compl_mul_pallas(x_pack, w_pack, tb, ts, m_valid):
    """x_pack: (2, Ci, B, S, 128) f32; w_pack: (2, Co, Ci, S, 128) f32
    -> (2, Co, B, S, 128) f32; contraction over Ci, elementwise over modes."""
    _, Ci, B, S, L = x_pack.shape
    Co = w_pack.shape[1]
    grid = (S // ts, B // tb)             # modes outer: weight block is not
                                          # re-fetched across inner batch steps
    x_spec = pl.BlockSpec((2, Ci, tb, ts, L), lambda m, b: (0, 0, b, m, 0))
    w_spec = pl.BlockSpec((2, Co, Ci, ts, L), lambda m, b: (0, 0, 0, m, 0))
    o_spec = pl.BlockSpec((2, Co, tb, ts, L), lambda m, b: (0, 0, b, m, 0))

    blk = _block_bytes(tb, Ci, Co, ts)
    cap = _vmem_capacity_bytes()
    vmem_limit = min(int(0.9 * cap), max(32 * 1024 * 1024, int(2.5 * blk)))

    cost = pl.CostEstimate(
        flops=int(10 * B * Ci * Co * m_valid),   # 3 mul + 7 add/sub, unpadded M
        transcendentals=0,
        bytes_accessed=int(4 * (x_pack.size + w_pack.size + 2 * Co * B * S * L)),
    )

    return pl.pallas_call(
        _compl_mul_kernel,
        out_shape=jax.ShapeDtypeStruct((2, Co, B, S, L), jnp.float32),
        grid_spec=pltpu.PrefetchScalarGridSpec(
            num_scalar_prefetch=0,
            grid=grid,
            in_specs=[x_spec, w_spec],
            out_specs=o_spec,
        ),
        compiler_params=pltpu.CompilerParams(
            dimension_semantics=("parallel", "parallel"),
            vmem_limit_bytes=vmem_limit,
        ),
        cost_estimate=cost,
    )(x_pack, w_pack)


@functools.partial(jax.jit, static_argnames=("modes1", "modes2"))
def spectral_conv2d(x, w1, w2, *, modes1, modes2):
    """Forward pass of SpectralConv2d.

    x  : (B, Cin, H, W) float32
    w1 : (Cin, Cout, modes1, modes2) complex64
    w2 : (Cin, Cout, modes1, modes2) complex64
    returns (B, Cout, H, W) float32
    """
    B, Ci, H, W = x.shape
    Co = w1.shape[1]
    Wf = W // 2 + 1
    m1, m2 = modes1, modes2
    assert 2 * m1 <= H, "modes1 too large: corner slices would overlap"
    assert m2 <= Wf, "modes2 exceeds rfft width"

    # --- FFT (plain JAX; no Pallas FFT primitive) -------------------------
    x_ft = jnp.fft.rfft2(x)                                 # (B, Ci, H, Wf)

    # --- gather retained-mode corners; flatten modes ----------------------
    M = 2 * m1 * m2
    top = x_ft[:, :, :m1, :m2]
    bot = x_ft[:, :, H - m1:, :m2]
    x_sel = jnp.stack([top, bot], axis=2).reshape(B, Ci, M).transpose(1, 0, 2)
    w_sel = jnp.stack([w1, w2], axis=2).reshape(Ci, Co, M).transpose(1, 0, 2)

    # --- layout plumbing: modes -> (S, 128) last-two dims, real/imag packed
    S = pl.cdiv(M, _LANES)
    tb, ts, s_pad = _plan_tiles(B, Ci, Co, S)
    Mp = s_pad * _LANES

    x_pack = jnp.stack([x_sel.real, x_sel.imag], axis=0).astype(jnp.float32)
    w_pack = jnp.stack([w_sel.real, w_sel.imag], axis=0).astype(jnp.float32)
    pad = Mp - M
    if pad:
        x_pack = jnp.pad(x_pack, ((0, 0), (0, 0), (0, 0), (0, pad)))
        w_pack = jnp.pad(w_pack, ((0, 0), (0, 0), (0, 0), (0, pad)))
    x_pack = x_pack.reshape(2, Ci, B, s_pad, _LANES)        # (2, Ci, B, S, 128)
    w_pack = w_pack.reshape(2, Co, Ci, s_pad, _LANES)       # (2, Co, Ci, S, 128)

    # --- hot path in Pallas -------------------------------------------------
    out_pack = _compl_mul_pallas(x_pack, w_pack, tb, ts, M)  # (2, Co, B, S, 128)

    out_flat = out_pack.reshape(2, Co, B, Mp)[:, :, :, :M]
    out_c = (out_flat[0] + 1j * out_flat[1]).astype(jnp.complex64)  # (Co, B, M)
    out_c = out_c.transpose(1, 0, 2).reshape(B, Co, 2, m1, m2)

    # --- assemble the output spectrum as three H-bands ----------------------
    pad_w = Wf - m2
    top_band = jnp.pad(out_c[:, :, 0], ((0, 0), (0, 0), (0, 0), (0, pad_w)))
    bot_band = jnp.pad(out_c[:, :, 1], ((0, 0), (0, 0), (0, 0), (0, pad_w)))
    mid_band = jnp.zeros((B, Co, H - 2 * m1, Wf), dtype=jnp.complex64)
    out_ft = jnp.concatenate([top_band, mid_band, bot_band], axis=2)

    # --- inverse FFT --------------------------------------------------------
    return jnp.fft.irfft2(out_ft, s=(H, W))


def _reference(x, w1, w2, modes1, modes2):
    """Pure-JAX reference mirroring the PyTorch forward."""
    B, Ci, H, W = x.shape
    Co = w1.shape[1]
    x_ft = jnp.fft.rfft2(x)
    out_ft = jnp.zeros((B, Co, H, W // 2 + 1), dtype=jnp.complex64)
    out_ft = out_ft.at[:, :, :modes1, :modes2].set(
        jnp.einsum("bixy,ioxy->boxy", x_ft[:, :, :modes1, :modes2], w1))
    out_ft = out_ft.at[:, :, H - modes1:, :modes2].set(
        jnp.einsum("bixy,ioxy->boxy", x_ft[:, :, H - modes1:, :modes2], w2))
    return jnp.fft.irfft2(out_ft, s=(H, W))


if __name__ == "__main__":
    # Small shapes consistent with the module: batch=2, in_ch=4, out_ch=4,
    # spatial 16x16, modes1=4, modes2=4 (<= W//2+1 = 9).
    B, Cin, Cout, H, W = 2, 4, 4, 16, 16
    modes1, modes2 = 4, 4

    key = jax.random.PRNGKey(0)
    kx, k1r, k1i, k2r, k2i = jax.random.split(key, 5)

    x = jax.random.normal(kx, (B, Cin, H, W), dtype=jnp.float32)

    # Deterministic synthetic params mirroring
    # scale * torch.rand(Cin, Cout, m1, m2, dtype=cfloat)
    scale = 1.0 / (Cin * Cout)
    wshape = (Cin, Cout, modes1, modes2)
    w1 = scale * (jax.random.uniform(k1r, wshape, dtype=jnp.float32)
                  + 1j * jax.random.uniform(k1i, wshape, dtype=jnp.float32))
    w2 = scale * (jax.random.uniform(k2r, wshape, dtype=jnp.float32)
                  + 1j * jax.random.uniform(k2i, wshape, dtype=jnp.float32))
    w1 = w1.astype(jnp.complex64)
    w2 = w2.astype(jnp.complex64)

    out = spectral_conv2d(x, w1, w2, modes1=modes1, modes2=modes2)
    out = jax.block_until_ready(out)

    ref = jax.block_until_ready(_reference(x, w1, w2, modes1, modes2))
    assert out.shape == (B, Cout, H, W)
    assert jnp.allclose(out, ref, atol=2e-5, rtol=2e-5), "mismatch vs reference"

    print("KERNEL_OK")
</pallas_src>

<mosaic_0001>
module attributes {stable_mosaic.version = 11 : i64} {
  func.func @_compl_mul_kernel(%arg0: i32, %arg1: i32, %arg2: memref<2x4x1x1x128xf32, #tpu.memory_space<vmem>>, %arg3: memref<2x4x4x1x128xf32, #tpu.memory_space<vmem>>, %arg4: memref<2x4x1x1x128xf32, #tpu.memory_space<vmem>>) attributes {dimension_semantics = [#tpu.dimension_semantics<parallel>, #tpu.dimension_semantics<parallel>], iteration_bounds = array<i64: 1, 2>, scalar_prefetch = 0 : i64, scratch_operands = 0 : i64, tpu.core_type = #tpu.core_type<tc>, window_params = [{transform_indices = @transform_0, window_bounds = array<i64: 2, 4, 1, 1, 128>}, {transform_indices = @transform_1, window_bounds = array<i64: 2, 4, 4, 1, 128>}, {transform_indices = @transform_2, window_bounds = array<i64: 2, 4, 1, 1, 128>}]} {
    %cst = arith.constant 0.000000e+00 : f32
    %0 = vector.broadcast %cst : f32 to vector<1x1x128xf32>
    %c0 = arith.constant 0 : index
    %c0_0 = arith.constant 0 : index
    %c0_1 = arith.constant 0 : index
    %c0_2 = arith.constant 0 : index
    %c0_3 = arith.constant 0 : index
    %1 = vector.load %arg2[%c0, %c0_0, %c0_1, %c0_2, %c0_3] : memref<2x4x1x1x128xf32, #tpu.memory_space<vmem>>, vector<1x1x1x1x128xf32>
    %2 = vector.shape_cast %1 : vector<1x1x1x1x128xf32> to vector<1x1x128xf32>
    %c1 = arith.constant 1 : index
    %c0_4 = arith.constant 0 : index
    %c0_5 = arith.constant 0 : index
    %c0_6 = arith.constant 0 : index
    %c0_7 = arith.constant 0 : index
    %3 = vector.load %arg2[%c1, %c0_4, %c0_5, %c0_6, %c0_7] : memref<2x4x1x1x128xf32, #tpu.memory_space<vmem>>, vector<1x1x1x1x128xf32>
    %4 = vector.shape_cast %3 : vector<1x1x1x1x128xf32> to vector<1x1x128xf32>
    %c0_8 = arith.constant 0 : index
    %c0_9 = arith.constant 0 : index
    %c0_10 = arith.constant 0 : index
    %c0_11 = arith.constant 0 : index
    %c0_12 = arith.constant 0 : index
    %5 = vector.load %arg3[%c0_8, %c0_9, %c0_10, %c0_11, %c0_12] : memref<2x4x4x1x128xf32, #tpu.memory_space<vmem>>, vector<1x1x1x1x128xf32>
    %6 = vector.shape_cast %5 : vector<1x1x1x1x128xf32> to vector<1x128xf32>
    %c1_13 = arith.constant 1 : index
    %c0_14 = arith.constant 0 : index
    %c0_15 = arith.constant 0 : index
    %c0_16 = arith.constant 0 : index
    %c0_17 = arith.constant 0 : index
    %7 = vector.load %arg3[%c1_13, %c0_14, %c0_15, %c0_16, %c0_17] : memref<2x4x4x1x128xf32, #tpu.memory_space<vmem>>, vector<1x1x1x1x128xf32>
    %8 = vector.shape_cast %7 : vector<1x1x1x1x128xf32> to vector<1x128xf32>
    %9 = arith.addf %2, %4 : vector<1x1x128xf32>
    %10 = vector.shape_cast %6 : vector<1x128xf32> to vector<1x1x128xf32>
    %11 = arith.mulf %10, %9 : vector<1x1x128xf32>
    %12 = arith.subf %8, %6 : vector<1x128xf32>
    %13 = vector.shape_cast %12 : vector<1x128xf32> to vector<1x1x128xf32>
    %14 = arith.mulf %2, %13 : vector<1x1x128xf32>
    %15 = arith.addf %6, %8 : vector<1x128xf32>
    %16 = vector.shape_cast %15 : vector<1x128xf32> to vector<1x1x128xf32>
    %17 = arith.mulf %4, %16 : vector<1x1x128xf32>
    %18 = arith.subf %11, %17 : vector<1x1x128xf32>
    %19 = arith.addf %0, %18 : vector<1x1x128xf32>
    %20 = arith.addf %11, %14 : vector<1x1x128xf32>
    %21 = arith.addf %0, %20 : vector<1x1x128xf32>
    %c0_18 = arith.constant 0 : index
    %c1_19 = arith.constant 1 : index
    %c0_20 = arith.constant 0 : index
    %c0_21 = arith.constant 0 : index
    %c0_22 = arith.constant 0 : index
    %22 = vector.load %arg2[%c0_18, %c1_19, %c0_20, %c0_21, %c0_22] : memref<2x4x1x1x128xf32, #tpu.memory_space<vmem>>, vector<1x1x1x1x128xf32>
    %23 = vector.shape_cast %22 : vector<1x1x1x1x128xf32> to vector<1x1x128xf32>
    %c1_23 = arith.constant 1 : index
    %c1_24 = arith.constant 1 : index
    %c0_25 = arith.constant 0 : index
    %c0_26 = arith.constant 0 : index
    %c0_27 = arith.constant 0 : index
    %24 = vector.load %arg2[%c1_23, %c1_24, %c0_25, %c0_26, %c0_27] : memref<2x4x1x1x128xf32, #tpu.memory_space<vmem>>, vector<1x1x1x1x128xf32>
    %25 = vector.shape_cast %24 : vector<1x1x1x1x128xf32> to vector<1x1x128xf32>
    %c0_28 = arith.constant 0 : index
    %c0_29 = arith.constant 0 : index
    %c1_30 = arith.constant 1 : index
    %c0_31 = arith.constant 0 : index
    %c0_32 = arith.constant 0 : index
    %26 = vector.load %arg3[%c0_28, %c0_29, %c1_30, %c0_31, %c0_32] : memref<2x4x4x1x128xf32, #tpu.memory_space<vmem>>, vector<1x1x1x1x128xf32>
    %27 = vector.shape_cast %26 : vector<1x1x1x1x128xf32> to vector<1x128xf32>
    %c1_33 = arith.constant 1 : index
    %c0_34 = arith.constant 0 : index
    %c1_35 = arith.constant 1 : index
    %c0_36 = arith.constant 0 : index
    %c0_37 = arith.constant 0 : index
    %28 = vector.load %arg3[%c1_33, %c0_34, %c1_35, %c0_36, %c0_37] : memref<2x4x4x1x128xf32, #tpu.memory_space<vmem>>, vector<1x1x1x1x128xf32>
    %29 = vector.shape_cast %28 : vector<1x1x1x1x128xf32> to vector<1x128xf32>
    %30 = arith.addf %23, %25 : vector<1x1x128xf32>
    %31 = vector.shape_cast %27 : vector<1x128xf32> to vector<1x1x128xf32>
    %32 = arith.mulf %31, %30 : vector<1x1x128xf32>
    %33 = arith.subf %29, %27 : vector<1x128xf32>
    %34 = vector.shape_cast %33 : vector<1x128xf32> to vector<1x1x128xf32>
    %35 = arith.mulf %23, %34 : vector<1x1x128xf32>
    %36 = arith.addf %27, %29 : vector<1x128xf32>
    %37 = vector.shape_cast %36 : vector<1x128xf32> to vector<1x1x128xf32>
    %38 = arith.mulf %25, %37 : vector<1x1x128xf32>
    %39 = arith.subf %32, %38 : vector<1x1x128xf32>
    %40 = arith.addf %19, %39 : vector<1x1x128xf32>
    %41 = arith.addf %32, %35 : vector<1x1x128xf32>
    %42 = arith.addf %21, %41 : vector<1x1x128xf32>
    %c0_38 = arith.constant 0 : index
    %c2 = arith.constant 2 : index
    %c0_39 = arith.constant 0 : index
    %c0_40 = arith.constant 0 : index
    %c0_41 = arith.constant 0 : index
    %43 = vector.load %arg2[%c0_38, %c2, %c0_39, %c0_40, %c0_41] : memref<2x4x1x1x128xf32, #tpu.memory_space<vmem>>, vector<1x1x1x1x128xf32>
    %44 = vector.shape_cast %43 : vector<1x1x1x1x128xf32> to vector<1x1x128xf32>
    %c1_42 = arith.constant 1 : index
    %c2_43 = arith.constant 2 : index
    %c0_44 = arith.constant 0 : index
    %c0_45 = arith.constant 0 : index
    %c0_46 = arith.constant 0 : index
    %45 = vector.load %arg2[%c1_42, %c2_43, %c0_44, %c0_45, %c0_46] : memref<2x4x1x1x128xf32, #tpu.memory_space<vmem>>, vector<1x1x1x1x128xf32>
    %46 = vector.shape_cast %45 : vector<1x1x1x1x128xf32> to vector<1x1x128xf32>
    %c0_47 = arith.constant 0 : index
    %c0_48 = arith.constant 0 : index
    %c2_49 = arith.constant 2 : index
    %c0_50 = arith.constant 0 : index
    %c0_51 = arith.constant 0 : index
    %47 = vector.load %arg3[%c0_47, %c0_48, %c2_49, %c0_50, %c0_51] : memref<2x4x4x1x128xf32, #tpu.memory_space<vmem>>, vector<1x1x1x1x128xf32>
    %48 = vector.shape_cast %47 : vector<1x1x1x1x128xf32> to vector<1x128xf32>
    %c1_52 = arith.constant 1 : index
    %c0_53 = arith.constant 0 : index
    %c2_54 = arith.constant 2 : index
    %c0_55 = arith.constant 0 : index
    %c0_56 = arith.constant 0 : index
    %49 = vector.load %arg3[%c1_52, %c0_53, %c2_54, %c0_55, %c0_56] : memref<2x4x4x1x128xf32, #tpu.memory_space<vmem>>, vector<1x1x1x1x128xf32>
    %50 = vector.shape_cast %49 : vector<1x1x1x1x128xf32> to vector<1x128xf32>
    %51 = arith.addf %44, %46 : vector<1x1x128xf32>
    %52 = vector.shape_cast %48 : vector<1x128xf32> to vector<1x1x128xf32>
    %53 = arith.mulf %52, %51 : vector<1x1x128xf32>
    %54 = arith.subf %50, %48 : vector<1x128xf32>
    %55 = vector.shape_cast %54 : vector<1x128xf32> to vector<1x1x128xf32>
    %56 = arith.mulf %44, %55 : vector<1x1x128xf32>
    %57 = arith.addf %48, %50 : vector<1x128xf32>
    %58 = vector.shape_cast %57 : vector<1x128xf32> to vector<1x1x128xf32>
    %59 = arith.mulf %46, %58 : vector<1x1x128xf32>
    %60 = arith.subf %53, %59 : vector<1x1x128xf32>
    %61 = arith.addf %40, %60 : vector<1x1x128xf32>
    %62 = arith.addf %53, %56 : vector<1x1x128xf32>
    %63 = arith.addf %42, %62 : vector<1x1x128xf32>
    %c0_57 = arith.constant 0 : index
    %c3 = arith.constant 3 : index
    %c0_58 = arith.constant 0 : index
    %c0_59 = arith.constant 0 : index
    %c0_60 = arith.constant 0 : index
    %64 = vector.load %arg2[%c0_57, %c3, %c0_58, %c0_59, %c0_60] : memref<2x4x1x1x128xf32, #tpu.memory_space<vmem>>, vector<1x1x1x1x128xf32>
    %65 = vector.shape_cast %64 : vector<1x1x1x1x128xf32> to vector<1x1x128xf32>
    %c1_61 = arith.constant 1 : index
    %c3_62 = arith.constant 3 : index
    %c0_63 = arith.constant 0 : index
    %c0_64 = arith.constant 0 : index
    %c0_65 = arith.constant 0 : index
    %66 = vector.load %arg2[%c1_61, %c3_62, %c0_63, %c0_64, %c0_65] : memref<2x4x1x1x128xf32, #tpu.memory_space<vmem>>, vector<1x1x1x1x128xf32>
    %67 = vector.shape_cast %66 : vector<1x1x1x1x128xf32> to vector<1x1x128xf32>
    %c0_66 = arith.constant 0 : index
    %c0_67 = arith.constant 0 : index
    %c3_68 = arith.constant 3 : index
    %c0_69 = arith.constant 0 : index
    %c0_70 = arith.constant 0 : index
    %68 = vector.load %arg3[%c0_66, %c0_67, %c3_68, %c0_69, %c0_70] : memref<2x4x4x1x128xf32, #tpu.memory_space<vmem>>, vector<1x1x1x1x128xf32>
    %69 = vector.shape_cast %68 : vector<1x1x1x1x128xf32> to vector<1x128xf32>
    %c1_71 = arith.constant 1 : index
    %c0_72 = arith.constant 0 : index
    %c3_73 = arith.constant 3 : index
    %c0_74 = arith.constant 0 : index
    %c0_75 = arith.constant 0 : index
    %70 = vector.load %arg3[%c1_71, %c0_72, %c3_73, %c0_74, %c0_75] : memref<2x4x4x1x128xf32, #tpu.memory_space<vmem>>, vector<1x1x1x1x128xf32>
    %71 = vector.shape_cast %70 : vector<1x1x1x1x128xf32> to vector<1x128xf32>
    %72 = arith.addf %65, %67 : vector<1x1x128xf32>
    %73 = vector.shape_cast %69 : vector<1x128xf32> to vector<1x1x128xf32>
    %74 = arith.mulf %73, %72 : vector<1x1x128xf32>
    %75 = arith.subf %71, %69 : vector<1x128xf32>
    %76 = vector.shape_cast %75 : vector<1x128xf32> to vector<1x1x128xf32>
    %77 = arith.mulf %65, %76 : vector<1x1x128xf32>
    %78 = arith.addf %69, %71 : vector<1x128xf32>
    %79 = vector.shape_cast %78 : vector<1x128xf32> to vector<1x1x128xf32>
    %80 = arith.mulf %67, %79 : vector<1x1x128xf32>
    %81 = arith.subf %74, %80 : vector<1x1x128xf32>
    %82 = arith.addf %61, %81 : vector<1x1x128xf32>
    %83 = arith.addf %74, %77 : vector<1x1x128xf32>
    %84 = arith.addf %63, %83 : vector<1x1x128xf32>
    %c0_76 = arith.constant 0 : index
    %c0_77 = arith.constant 0 : index
    %c0_78 = arith.constant 0 : index
    %c0_79 = arith.constant 0 : index
    %c0_80 = arith.constant 0 : index
    %85 = vector.load %arg4[%c0_76, %c0_77, %c0_78, %c0_79, %c0_80] : memref<2x4x1x1x128xf32, #tpu.memory_space<vmem>>, vector<1x1x1x1x128xf32>
    %86 = vector.shape_cast %85 : vector<1x1x1x1x128xf32> to vector<1x1x128xf32>
    %87 = vector.shape_cast %82 : vector<1x1x128xf32> to vector<1x1x1x1x128xf32>
    tpu.vector_store %arg4[%c0_76, %c0_77, %c0_78, %c0_79, %c0_80], %87 {strides = array<i32>} : memref<2x4x1x1x128xf32, #tpu.memory_space<vmem>>, vector<1x1x1x1x128xf32>,
    %c1_81 = arith.constant 1 : index
    %c0_82 = arith.constant 0 : index
    %c0_83 = arith.constant 0 : index
    %c0_84 = arith.constant 0 : index
    %c0_85 = arith.constant 0 : index
    %88 = vector.load %arg4[%c1_81, %c0_82, %c0_83, %c0_84, %c0_85] : memref<2x4x1x1x128xf32, #tpu.memory_space<vmem>>, vector<1x1x1x1x128xf32>
    %89 = vector.shape_cast %88 : vector<1x1x1x1x128xf32> to vector<1x1x128xf32>
    %90 = vector.shape_cast %84 : vector<1x1x128xf32> to vector<1x1x1x1x128xf32>
    tpu.vector_store %arg4[%c1_81, %c0_82, %c0_83, %c0_84, %c0_85], %90 {strides = array<i32>} : memref<2x4x1x1x128xf32, #tpu.memory_space<vmem>>, vector<1x1x1x1x128xf32>,
    %cst_86 = arith.constant 0.000000e+00 : f32
    %91 = vector.broadcast %cst_86 : f32 to vector<1x1x128xf32>
    %c0_87 = arith.constant 0 : index
    %c0_88 = arith.constant 0 : index
    %c0_89 = arith.constant 0 : index
    %c0_90 = arith.constant 0 : index
    %c0_91 = arith.constant 0 : index
    %92 = vector.load %arg2[%c0_87, %c0_88, %c0_89, %c0_90, %c0_91] : memref<2x4x1x1x128xf32, #tpu.memory_space<vmem>>, vector<1x1x1x1x128xf32>
    %93 = vector.shape_cast %92 : vector<1x1x1x1x128xf32> to vector<1x1x128xf32>
    %c1_92 = arith.constant 1 : index
    %c0_93 = arith.constant 0 : index
    %c0_94 = arith.constant 0 : index
    %c0_95 = arith.constant 0 : index
    %c0_96 = arith.constant 0 : index
    %94 = vector.load %arg2[%c1_92, %c0_93, %c0_94, %c0_95, %c0_96] : memref<2x4x1x1x128xf32, #tpu.memory_space<vmem>>, vector<1x1x1x1x128xf32>
    %95 = vector.shape_cast %94 : vector<1x1x1x1x128xf32> to vector<1x1x128xf32>
    %c0_97 = arith.constant 0 : index
    %c1_98 = arith.constant 1 : index
    %c0_99 = arith.constant 0 : index
    %c0_100 = arith.constant 0 : index
    %c0_101 = arith.constant 0 : index
    %96 = vector.load %arg3[%c0_97, %c1_98, %c0_99, %c0_100, %c0_101] : memref<2x4x4x1x128xf32, #tpu.memory_space<vmem>>, vector<1x1x1x1x128xf32>
    %97 = vector.shape_cast %96 : vector<1x1x1x1x128xf32> to vector<1x128xf32>
    %c1_102 = arith.constant 1 : index
    %c1_103 = arith.constant 1 : index
    %c0_104 = arith.constant 0 : index
    %c0_105 = arith.constant 0 : index
    %c0_106 = arith.constant 0 : index
    %98 = vector.load %arg3[%c1_102, %c1_103, %c0_104, %c0_105, %c0_106] : memref<2x4x4x1x128xf32, #tpu.memory_space<vmem>>, vector<1x1x1x1x128xf32>
    %99 = vector.shape_cast %98 : vector<1x1x1x1x128xf32> to vector<1x128xf32>
    %100 = arith.addf %93, %95 : vector<1x1x128xf32>
    %101 = vector.shape_cast %97 : vector<1x128xf32> to vector<1x1x128xf32>
    %102 = arith.mulf %101, %100 : vector<1x1x128xf32>
    %103 = arith.subf %99, %97 : vector<1x128xf32>
    %104 = vector.shape_cast %103 : vector<1x128xf32> to vector<1x1x128xf32>
    %105 = arith.mulf %93, %104 : vector<1x1x128xf32>
    %106 = arith.addf %97, %99 : vector<1x128xf32>
    %107 = vector.shape_cast %106 : vector<1x128xf32> to vector<1x1x128xf32>
    %108 = arith.mulf %95, %107 : vector<1x1x128xf32>
    %109 = arith.subf %102, %108 : vector<1x1x128xf32>
    %110 = arith.addf %91, %109 : vector<1x1x128xf32>
    %111 = arith.addf %102, %105 : vector<1x1x128xf32>
    %112 = arith.addf %91, %111 : vector<1x1x128xf32>
    %c0_107 = arith.constant 0 : index
    %c1_108 = arith.constant 1 : index
    %c0_109 = arith.constant 0 : index
    %c0_110 = arith.constant 0 : index
    %c0_111 = arith.constant 0 : index
    %113 = vector.load %arg2[%c0_107, %c1_108, %c0_109, %c0_110, %c0_111] : memref<2x4x1x1x128xf32, #tpu.memory_space<vmem>>, vector<1x1x1x1x128xf32>
    %114 = vector.shape_cast %113 : vector<1x1x1x1x128xf32> to vector<1x1x128xf32>
    %c1_112 = arith.constant 1 : index
    %c1_113 = arith.constant 1 : index
    %c0_114 = arith.constant 0 : index
    %c0_115 = arith.constant 0 : index
    %c0_116 = arith.constant 0 : index
    %115 = vector.load %arg2[%c1_112, %c1_113, %c0_114, %c0_115, %c0_116] : memref<2x4x1x1x128xf32, #tpu.memory_space<vmem>>, vector<1x1x1x1x128xf32>
    %116 = vector.shape_cast %115 : vector<1x1x1x1x128xf32> to vector<1x1x128xf32>
    %c0_117 = arith.constant 0 : index
    %c1_118 = arith.constant 1 : index
    %c1_119 = arith.constant 1 : index
    %c0_120 = arith.constant 0 : index
    %c0_121 = arith.constant 0 : index
    %117 = vector.load %arg3[%c0_117, %c1_118, %c1_119, %c0_120, %c0_121] : memref<2x4x4x1x128xf32, #tpu.memory_space<vmem>>, vector<1x1x1x1x128xf32>
    %118 = vector.shape_cast %117 : vector<1x1x1x1x128xf32> to vector<1x128xf32>
    %c1_122 = arith.constant 1 : index
    %c1_123 = arith.constant 1 : index
    %c1_124 = arith.constant 1 : index
    %c0_125 = arith.constant 0 : index
    %c0_126 = arith.constant 0 : index
    %119 = vector.load %arg3[%c1_122, %c1_123, %c1_124, %c0_125, %c0_126] : memref<2x4x4x1x128xf32, #tpu.memory_space<vmem>>, vector<1x1x1x1x128xf32>
    %120 = vector.shape_cast %119 : vector<1x1x1x1x128xf32> to vector<1x128xf32>
    %121 = arith.addf %114, %116 : vector<1x1x128xf32>
    %122 = vector.shape_cast %118 : vector<1x128xf32> to vector<1x1x128xf32>
    %123 = arith.mulf %122, %121 : vector<1x1x128xf32>
    %124 = arith.subf %120, %118 : vector<1x128xf32>
    %125 = vector.shape_cast %124 : vector<1x128xf32> to vector<1x1x128xf32>
    %126 = arith.mulf %114, %125 : vector<1x1x128xf32>
    %127 = arith.addf %118, %120 : vector<1x128xf32>
    %128 = vector.shape_cast %127 : vector<1x128xf32> to vector<1x1x128xf32>
    %129 = arith.mulf %116, %128 : vector<1x1x128xf32>
    %130 = arith.subf %123, %129 : vector<1x1x128xf32>
    %131 = arith.addf %110, %130 : vector<1x1x128xf32>
    %132 = arith.addf %123, %126 : vector<1x1x128xf32>
    %133 = arith.addf %112, %132 : vector<1x1x128xf32>
    %c0_127 = arith.constant 0 : index
    %c2_128 = arith.constant 2 : index
    %c0_129 = arith.constant 0 : index
    %c0_130 = arith.constant 0 : index
    %c0_131 = arith.constant 0 : index
    %134 = vector.load %arg2[%c0_127, %c2_128, %c0_129, %c0_130, %c0_131] : memref<2x4x1x1x128xf32, #tpu.memory_space<vmem>>, vector<1x1x1x1x128xf32>
    %135 = vector.shape_cast %134 : vector<1x1x1x1x128xf32> to vector<1x1x128xf32>
    %c1_132 = arith.constant 1 : index
    %c2_133 = arith.constant 2 : index
    %c0_134 = arith.constant 0 : index
    %c0_135 = arith.constant 0 : index
    %c0_136 = arith.constant 0 : index
    %136 = vector.load %arg2[%c1_132, %c2_133, %c0_134, %c0_135, %c0_136] : memref<2x4x1x1x128xf32, #tpu.memory_space<vmem>>, vector<1x1x1x1x128xf32>
    %137 = vector.shape_cast %136 : vector<1x1x1x1x128xf32> to vector<1x1x128xf32>
    %c0_137 = arith.constant 0 : index
    %c1_138 = arith.constant 1 : index
    %c2_139 = arith.constant 2 : index
    %c0_140 = arith.constant 0 : index
    %c0_141 = arith.constant 0 : index
    %138 = vector.load %arg3[%c0_137, %c1_138, %c2_139, %c0_140, %c0_141] : memref<2x4x4x1x128xf32, #tpu.memory_space<vmem>>, vector<1x1x1x1x128xf32>
    %139 = vector.shape_cast %138 : vector<1x1x1x1x128xf32> to vector<1x128xf32>
    %c1_142 = arith.constant 1 : index
    %c1_143 = arith.constant 1 : index
    %c2_144 = arith.constant 2 : index
    %c0_145 = arith.constant 0 : index
    %c0_146 = arith.constant 0 : index
    %140 = vector.load %arg3[%c1_142, %c1_143, %c2_144, %c0_145, %c0_146] : memref<2x4x4x1x128xf32, #tpu.memory_space<vmem>>, vector<1x1x1x1x128xf32>
    %141 = vector.shape_cast %140 : vector<1x1x1x1x128xf32> to vector<1x128xf32>
    %142 = arith.addf %135, %137 : vector<1x1x128xf32>
    %143 = vector.shape_cast %139 : vector<1x128xf32> to vector<1x1x128xf32>
    %144 = arith.mulf %143, %142 : vector<1x1x128xf32>
    %145 = arith.subf %141, %139 : vector<1x128xf32>
    %146 = vector.shape_cast %145 : vector<1x128xf32> to vector<1x1x128xf32>
    %147 = arith.mulf %135, %146 : vector<1x1x128xf32>
    %148 = arith.addf %139, %141 : vector<1x128xf32>
    %149 = vector.shape_cast %148 : vector<1x128xf32> to vector<1x1x128xf32>
    %150 = arith.mulf %137, %149 : vector<1x1x128xf32>
    %151 = arith.subf %144, %150 : vector<1x1x128xf32>
    %152 = arith.addf %131, %151 : vector<1x1x128xf32>
    %153 = arith.addf %144, %147 : vector<1x1x128xf32>
    %154 = arith.addf %133, %153 : vector<1x1x128xf32>
    %c0_147 = arith.constant 0 : index
    %c3_148 = arith.constant 3 : index
    %c0_149 = arith.constant 0 : index
    %c0_150 = arith.constant 0 : index
    %c0_151 = arith.constant 0 : index
    %155 = vector.load %arg2[%c0_147, %c3_148, %c0_149, %c0_150, %c0_151] : memref<2x4x1x1x128xf32, #tpu.memory_space<vmem>>, vector<1x1x1x1x128xf32>
    %156 = vector.shape_cast %155 : vector<1x1x1x1x128xf32> to vector<1x1x128xf32>
    %c1_152 = arith.constant 1 : index
    %c3_153 = arith.constant 3 : index
    %c0_154 = arith.constant 0 : index
    %c0_155 = arith.constant 0 : index
    %c0_156 = arith.constant 0 : index
    %157 = vector.load %arg2[%c1_152, %c3_153, %c0_154, %c0_155, %c0_156] : memref<2x4x1x1x128xf32, #tpu.memory_space<vmem>>, vector<1x1x1x1x128xf32>
    %158 = vector.shape_cast %157 : vector<1x1x1x1x128xf32> to vector<1x1x128xf32>
    %c0_157 = arith.constant 0 : index
    %c1_158 = arith.constant 1 : index
    %c3_159 = arith.constant 3 : index
    %c0_160 = arith.constant 0 : index
    %c0_161 = arith.constant 0 : index
    %159 = vector.load %arg3[%c0_157, %c1_158, %c3_159, %c0_160, %c0_161] : memref<2x4x4x1x128xf32, #tpu.memory_space<vmem>>, vector<1x1x1x1x128xf32>
    %160 = vector.shape_cast %159 : vector<1x1x1x1x128xf32> to vector<1x128xf32>
    %c1_162 = arith.constant 1 : index
    %c1_163 = arith.constant 1 : index
    %c3_164 = arith.constant 3 : index
    %c0_165 = arith.constant 0 : index
    %c0_166 = arith.constant 0 : index
    %161 = vector.load %arg3[%c1_162, %c1_163, %c3_164, %c0_165, %c0_166] : memref<2x4x4x1x128xf32, #tpu.memory_space<vmem>>, vector<1x1x1x1x128xf32>
    %162 = vector.shape_cast %161 : vector<1x1x1x1x128xf32> to vector<1x128xf32>
    %163 = arith.addf %156, %158 : vector<1x1x128xf32>
    %164 = vector.shape_cast %160 : vector<1x128xf32> to vector<1x1x128xf32>
    %165 = arith.mulf %164, %163 : vector<1x1x128xf32>
    %166 = arith.subf %162, %160 : vector<1x128xf32>
    %167 = vector.shape_cast %166 : vector<1x128xf32> to vector<1x1x128xf32>
    %168 = arith.mulf %156, %167 : vector<1x1x128xf32>
    %169 = arith.addf %160, %162 : vector<1x128xf32>
    %170 = vector.shape_cast %169 : vector<1x128xf32> to vector<1x1x128xf32>
    %171 = arith.mulf %158, %170 : vector<1x1x128xf32>
    %172 = arith.subf %165, %171 : vector<1x1x128xf32>
    %173 = arith.addf %152, %172 : vector<1x1x128xf32>
    %174 = arith.addf %165, %168 : vector<1x1x128xf32>
    %175 = arith.addf %154, %174 : vector<1x1x128xf32>
    %c0_167 = arith.constant 0 : index
    %c1_168 = arith.constant 1 : index
    %c0_169 = arith.constant 0 : index
    %c0_170 = arith.constant 0 : index
    %c0_171 = arith.constant 0 : index
    %176 = vector.load %arg4[%c0_167, %c1_168, %c0_169, %c0_170, %c0_171] : memref<2x4x1x1x128xf32, #tpu.memory_space<vmem>>, vector<1x1x1x1x128xf32>
    %177 = vector.shape_cast %176 : vector<1x1x1x1x128xf32> to vector<1x1x128xf32>
    %178 = vector.shape_cast %173 : vector<1x1x128xf32> to vector<1x1x1x1x128xf32>
    tpu.vector_store %arg4[%c0_167, %c1_168, %c0_169, %c0_170, %c0_171], %178 {strides = array<i32>} : memref<2x4x1x1x128xf32, #tpu.memory_space<vmem>>, vector<1x1x1x1x128xf32>,
    %c1_172 = arith.constant 1 : index
    %c1_173 = arith.constant 1 : index
    %c0_174 = arith.constant 0 : index
    %c0_175 = arith.constant 0 : index
    %c0_176 = arith.constant 0 : index
    %179 = vector.load %arg4[%c1_172, %c1_173, %c0_174, %c0_175, %c0_176] : memref<2x4x1x1x128xf32, #tpu.memory_space<vmem>>, vector<1x1x1x1x128xf32>
    %180 = vector.shape_cast %179 : vector<1x1x1x1x128xf32> to vector<1x1x128xf32>
    %181 = vector.shape_cast %175 : vector<1x1x128xf32> to vector<1x1x1x1x128xf32>
    tpu.vector_store %arg4[%c1_172, %c1_173, %c0_174, %c0_175, %c0_176], %181 {strides = array<i32>} : memref<2x4x1x1x128xf32, #tpu.memory_space<vmem>>, vector<1x1x1x1x128xf32>,
    %cst_177 = arith.constant 0.000000e+00 : f32
    %182 = vector.broadcast %cst_177 : f32 to vector<1x1x128xf32>
    %c0_178 = arith.constant 0 : index
    %c0_179 = arith.constant 0 : index
    %c0_180 = arith.constant 0 : index
    %c0_181 = arith.constant 0 : index
    %c0_182 = arith.constant 0 : index
    %183 = vector.load %arg2[%c0_178, %c0_179, %c0_180, %c0_181, %c0_182] : memref<2x4x1x1x128xf32, #tpu.memory_space<vmem>>, vector<1x1x1x1x128xf32>
    %184 = vector.shape_cast %183 : vector<1x1x1x1x128xf32> to vector<1x1x128xf32>
    %c1_183 = arith.constant 1 : index
    %c0_184 = arith.constant 0 : index
    %c0_185 = arith.constant 0 : index
    %c0_186 = arith.constant 0 : index
    %c0_187 = arith.constant 0 : index
    %185 = vector.load %arg2[%c1_183, %c0_184, %c0_185, %c0_186, %c0_187] : memref<2x4x1x1x128xf32, #tpu.memory_space<vmem>>, vector<1x1x1x1x128xf32>
    %186 = vector.shape_cast %185 : vector<1x1x1x1x128xf32> to vector<1x1x128xf32>
    %c0_188 = arith.constant 0 : index
    %c2_189 = arith.constant 2 : index
    %c0_190 = arith.constant 0 : index
    %c0_191 = arith.constant 0 : index
    %c0_192 = arith.constant 0 : index
    %187 = vector.load %arg3[%c0_188, %c2_189, %c0_190, %c0_191, %c0_192] : memref<2x4x4x1x128xf32, #tpu.memory_space<vmem>>, vector<1x1x1x1x128xf32>
    %188 = vector.shape_cast %187 : vector<1x1x1x1x128xf32> to vector<1x128xf32>
    %c1_193 = arith.constant 1 : index
    %c2_194 = arith.constant 2 : index
    %c0_195 = arith.constant 0 : index
    %c0_196 = arith.constant 0 : index
    %c0_197 = arith.constant 0 : index
    %189 = vector.load %arg3[%c1_193, %c2_194, %c0_195, %c0_196, %c0_197] : memref<2x4x4x1x128xf32, #tpu.memory_space<vmem>>, vector<1x1x1x1x128xf32>
    %190 = vector.shape_cast %189 : vector<1x1x1x1x128xf32> to vector<1x128xf32>
    %191 = arith.addf %184, %186 : vector<1x1x128xf32>
    %192 = vector.shape_cast %188 : vector<1x128xf32> to vector<1x1x128xf32>
    %193 = arith.mulf %192, %191 : vector<1x1x128xf32>
    %194 = arith.subf %190, %188 : vector<1x128xf32>
    %195 = vector.shape_cast %194 : vector<1x128xf32> to vector<1x1x128xf32>
    %196 = arith.mulf %184, %195 : vector<1x1x128xf32>
    %197 = arith.addf %188, %190 : vector<1x128xf32>
    %198 = vector.shape_cast %197 : vector<1x128xf32> to vector<1x1x128xf32>
    %199 = arith.mulf %186, %198 : vector<1x1x128xf32>
    %200 = arith.subf %193, %199 : vector<1x1x128xf32>
    %201 = arith.addf %182, %200 : vector<1x1x128xf32>
    %202 = arith.addf %193, %196 : vector<1x1x128xf32>
    %203 = arith.addf %182, %202 : vector<1x1x128xf32>
    %c0_198 = arith.constant 0 : index
    %c1_199 = arith.constant 1 : index
    %c0_200 = arith.constant 0 : index
    %c0_201 = arith.constant 0 : index
    %c0_202 = arith.constant 0 : index
    %204 = vector.load %arg2[%c0_198, %c1_199, %c0_200, %c0_201, %c0_202] : memref<2x4x1x1x128xf32, #tpu.memory_space<vmem>>, vector<1x1x1x1x128xf32>
    %205 = vector.shape_cast %204 : vector<1x1x1x1x128xf32> to vector<1x1x128xf32>
    %c1_203 = arith.constant 1 : index
    %c1_204 = arith.constant 1 : index
    %c0_205 = arith.constant 0 : index
    %c0_206 = arith.constant 0 : index
    %c0_207 = arith.constant 0 : index
    %206 = vector.load %arg2[%c1_203, %c1_204, %c0_205, %c0_206, %c0_207] : memref<2x4x1x1x128xf32, #tpu.memory_space<vmem>>, vector<1x1x1x1x128xf32>
    %207 = vector.shape_cast %206 : vector<1x1x1x1x128xf32> to vector<1x1x128xf32>
    %c0_208 = arith.constant 0 : index
    %c2_209 = arith.constant 2 : index
    %c1_210 = arith.constant 1 : index
    %c0_211 = arith.constant 0 : index
    %c0_212 = arith.constant 0 : index
    %208 = vector.load %arg3[%c0_208, %c2_209, %c1_210, %c0_211, %c0_212] : memref<2x4x4x1x128xf32, #tpu.memory_space<vmem>>, vector<1x1x1x1x128xf32>
    %209 = vector.shape_cast %208 : vector<1x1x1x1x128xf32> to vector<1x128xf32>
    %c1_213 = arith.constant 1 : index
    %c2_214 = arith.constant 2 : index
    %c1_215 = arith.constant 1 : index
    %c0_216 = arith.constant 0 : index
    %c0_217 = arith.constant 0 : index
    %210 = vector.load %arg3[%c1_213, %c2_214, %c1_215, %c0_216, %c0_217] : memref<2x4x4x1x128xf32, #tpu.memory_space<vmem>>, vector<1x1x1x1x128xf32>
    %211 = vector.shape_cast %210 : vector<1x1x1x1x128xf32> to vector<1x128xf32>
    %212 = arith.addf %205, %207 : vector<1x1x128xf32>
    %213 = vector.shape_cast %209 : vector<1x128xf32> to vector<1x1x128xf32>
    %214 = arith.mulf %213, %212 : vector<1x1x128xf32>
    %215 = arith.subf %211, %209 : vector<1x128xf32>
    %216 = vector.shape_cast %215 : vector<1x128xf32> to vector<1x1x128xf32>
    %217 = arith.mulf %205, %216 : vector<1x1x128xf32>
    %218 = arith.addf %209, %211 : vector<1x128xf32>
    %219 = vector.shape_cast %218 : vector<1x128xf32> to vector<1x1x128xf32>
    %220 = arith.mulf %207, %219 : vector<1x1x128xf32>
    %221 = arith.subf %214, %220 : vector<1x1x128xf32>
    %222 = arith.addf %201, %221 : vector<1x1x128xf32>
    %223 = arith.addf %214, %217 : vector<1x1x128xf32>
    %224 = arith.addf %203, %223 : vector<1x1x128xf32>
    %c0_218 = arith.constant 0 : index
    %c2_219 = arith.constant 2 : index
    %c0_220 = arith.constant 0 : index
    %c0_221 = arith.constant 0 : index
    %c0_222 = arith.constant 0 : index
    %225 = vector.load %arg2[%c0_218, %c2_219, %c0_220, %c0_221, %c0_222] : memref<2x4x1x1x128xf32, #tpu.memory_space<vmem>>, vector<1x1x1x1x128xf32>
    %226 = vector.shape_cast %225 : vector<1x1x1x1x128xf32> to vector<1x1x128xf32>
    %c1_223 = arith.constant 1 : index
    %c2_224 = arith.constant 2 : index
    %c0_225 = arith.constant 0 : index
    %c0_226 = arith.constant 0 : index
    %c0_227 = arith.constant 0 : index
    %227 = vector.load %arg2[%c1_223, %c2_224, %c0_225, %c0_226, %c0_227] : memref<2x4x1x1x128xf32, #tpu.memory_space<vmem>>, vector<1x1x1x1x128xf32>
    %228 = vector.shape_cast %227 : vector<1x1x1x1x128xf32> to vector<1x1x128xf32>
    %c0_228 = arith.constant 0 : index
    %c2_229 = arith.constant 2 : index
    %c2_230 = arith.constant 2 : index
    %c0_231 = arith.constant 0 : index
    %c0_232 = arith.constant 0 : index
    %229 = vector.load %arg3[%c0_228, %c2_229, %c2_230, %c0_231, %c0_232] : memref<2x4x4x1x128xf32, #tpu.memory_space<vmem>>, vector<1x1x1x1x128xf32>
    %230 = vector.shape_cast %229 : vector<1x1x1x1x128xf32> to vector<1x128xf32>
    %c1_233 = arith.constant 1 : index
    %c2_234 = arith.constant 2 : index
    %c2_235 = arith.constant 2 : index
    %c0_236 = arith.constant 0 : index
    %c0_237 = arith.constant 0 : index
    %231 = vector.load %arg3[%c1_233, %c2_234, %c2_235, %c0_236, %c0_237] : memref<2x4x4x1x128xf32, #tpu.memory_space<vmem>>, vector<1x1x1x1x128xf32>
    %232 = vector.shape_cast %231 : vector<1x1x1x1x128xf32> to vector<1x128xf32>
    %233 = arith.addf %226, %228 : vector<1x1x128xf32>
    %234 = vector.shape_cast %230 : vector<1x128xf32> to vector<1x1x128xf32>
    %235 = arith.mulf %234, %233 : vector<1x1x128xf32>
    %236 = arith.subf %232, %230 : vector<1x128xf32>
    %237 = vector.shape_cast %236 : vector<1x128xf32> to vector<1x1x128xf32>
    %238 = arith.mulf %226, %237 : vector<1x1x128xf32>
    %239 = arith.addf %230, %232 : vector<1x128xf32>
    %240 = vector.shape_cast %239 : vector<1x128xf32> to vector<1x1x128xf32>
    %241 = arith.mulf %228, %240 : vector<1x1x128xf32>
    %242 = arith.subf %235, %241 : vector<1x1x128xf32>
    %243 = arith.addf %222, %242 : vector<1x1x128xf32>
    %244 = arith.addf %235, %238 : vector<1x1x128xf32>
    %245 = arith.addf %224, %244 : vector<1x1x128xf32>
    %c0_238 = arith.constant 0 : index
    %c3_239 = arith.constant 3 : index
    %c0_240 = arith.constant 0 : index
    %c0_241 = arith.constant 0 : index
    %c0_242 = arith.constant 0 : index
    %246 = vector.load %arg2[%c0_238, %c3_239, %c0_240, %c0_241, %c0_242] : memref<2x4x1x1x128xf32, #tpu.memory_space<vmem>>, vector<1x1x1x1x128xf32>
    %247 = vector.shape_cast %246 : vector<1x1x1x1x128xf32> to vector<1x1x128xf32>
    %c1_243 = arith.constant 1 : index
    %c3_244 = arith.constant 3 : index
    %c0_245 = arith.constant 0 : index
    %c0_246 = arith.constant 0 : index
    %c0_247 = arith.constant 0 : index
    %248 = vector.load %arg2[%c1_243, %c3_244, %c0_245, %c0_246, %c0_247] : memref<2x4x1x1x128xf32, #tpu.memory_space<vmem>>, vector<1x1x1x1x128xf32>
    %249 = vector.shape_cast %248 : vector<1x1x1x1x128xf32> to vector<1x1x128xf32>
    %c0_248 = arith.constant 0 : index
    %c2_249 = arith.constant 2 : index
    %c3_250 = arith.constant 3 : index
    %c0_251 = arith.constant 0 : index
    %c0_252 = arith.constant 0 : index
    %250 = vector.load %arg3[%c0_248, %c2_249, %c3_250, %c0_251, %c0_252] : memref<2x4x4x1x128xf32, #tpu.memory_space<vmem>>, vector<1x1x1x1x128xf32>
    %251 = vector.shape_cast %250 : vector<1x1x1x1x128xf32> to vector<1x128xf32>
    %c1_253 = arith.constant 1 : index
    %c2_254 = arith.constant 2 : index
    %c3_255 = arith.constant 3 : index
    %c0_256 = arith.constant 0 : index
    %c0_257 = arith.constant 0 : index
    %252 = vector.load %arg3[%c1_253, %c2_254, %c3_255, %c0_256, %c0_257] : memref<2x4x4x1x128xf32, #tpu.memory_space<vmem>>, vector<1x1x1x1x128xf32>
    %253 = vector.shape_cast %252 : vector<1x1x1x1x128xf32> to vector<1x128xf32>
    %254 = arith.addf %247, %249 : vector<1x1x128xf32>
    %255 = vector.shape_cast %251 : vector<1x128xf32> to vector<1x1x128xf32>
    %256 = arith.mulf %255, %254 : vector<1x1x128xf32>
    %257 = arith.subf %253, %251 : vector<1x128xf32>
    %258 = vector.shape_cast %257 : vector<1x128xf32> to vector<1x1x128xf32>
    %259 = arith.mulf %247, %258 : vector<1x1x128xf32>
    %260 = arith.addf %251, %253 : vector<1x128xf32>
    %261 = vector.shape_cast %260 : vector<1x128xf32> to vector<1x1x128xf32>
    %262 = arith.mulf %249, %261 : vector<1x1x128xf32>
    %263 = arith.subf %256, %262 : vector<1x1x128xf32>
    %264 = arith.addf %243, %263 : vector<1x1x128xf32>
    %265 = arith.addf %256, %259 : vector<1x1x128xf32>
    %266 = arith.addf %245, %265 : vector<1x1x128xf32>
    %c0_258 = arith.constant 0 : index
    %c2_259 = arith.constant 2 : index
    %c0_260 = arith.constant 0 : index
    %c0_261 = arith.constant 0 : index
    %c0_262 = arith.constant 0 : index
    %267 = vector.load %arg4[%c0_258, %c2_259, %c0_260, %c0_261, %c0_262] : memref<2x4x1x1x128xf32, #tpu.memory_space<vmem>>, vector<1x1x1x1x128xf32>
    %268 = vector.shape_cast %267 : vector<1x1x1x1x128xf32> to vector<1x1x128xf32>
    %269 = vector.shape_cast %264 : vector<1x1x128xf32> to vector<1x1x1x1x128xf32>
    tpu.vector_store %arg4[%c0_258, %c2_259, %c0_260, %c0_261, %c0_262], %269 {strides = array<i32>} : memref<2x4x1x1x128xf32, #tpu.memory_space<vmem>>, vector<1x1x1x1x128xf32>,
    %c1_263 = arith.constant 1 : index
    %c2_264 = arith.constant 2 : index
    %c0_265 = arith.constant 0 : index
    %c0_266 = arith.constant 0 : index
    %c0_267 = arith.constant 0 : index
    %270 = vector.load %arg4[%c1_263, %c2_264, %c0_265, %c0_266, %c0_267] : memref<2x4x1x1x128xf32, #tpu.memory_space<vmem>>, vector<1x1x1x1x128xf32>
    %271 = vector.shape_cast %270 : vector<1x1x1x1x128xf32> to vector<1x1x128xf32>
    %272 = vector.shape_cast %266 : vector<1x1x128xf32> to vector<1x1x1x1x128xf32>
    tpu.vector_store %arg4[%c1_263, %c2_264, %c0_265, %c0_266, %c0_267], %272 {strides = array<i32>} : memref<2x4x1x1x128xf32, #tpu.memory_space<vmem>>, vector<1x1x1x1x128xf32>,
    %cst_268 = arith.constant 0.000000e+00 : f32
    %273 = vector.broadcast %cst_268 : f32 to vector<1x1x128xf32>
    %c0_269 = arith.constant 0 : index
    %c0_270 = arith.constant 0 : index
    %c0_271 = arith.constant 0 : index
    %c0_272 = arith.constant 0 : index
    %c0_273 = arith.constant 0 : index
    %274 = vector.load %arg2[%c0_269, %c0_270, %c0_271, %c0_272, %c0_273] : memref<2x4x1x1x128xf32, #tpu.memory_space<vmem>>, vector<1x1x1x1x128xf32>
    %275 = vector.shape_cast %274 : vector<1x1x1x1x128xf32> to vector<1x1x128xf32>
    %c1_274 = arith.constant 1 : index
    %c0_275 = arith.constant 0 : index
    %c0_276 = arith.constant 0 : index
    %c0_277 = arith.constant 0 : index
    %c0_278 = arith.constant 0 : index
    %276 = vector.load %arg2[%c1_274, %c0_275, %c0_276, %c0_277, %c0_278] : memref<2x4x1x1x128xf32, #tpu.memory_space<vmem>>, vector<1x1x1x1x128xf32>
    %277 = vector.shape_cast %276 : vector<1x1x1x1x128xf32> to vector<1x1x128xf32>
    %c0_279 = arith.constant 0 : index
    %c3_280 = arith.constant 3 : index
    %c0_281 = arith.constant 0 : index
    %c0_282 = arith.constant 0 : index
    %c0_283 = arith.constant 0 : index
    %278 = vector.load %arg3[%c0_279, %c3_280, %c0_281, %c0_282, %c0_283] : memref<2x4x4x1x128xf32, #tpu.memory_space<vmem>>, vector<1x1x1x1x128xf32>
    %279 = vector.shape_cast %278 : vector<1x1x1x1x128xf32> to vector<1x128xf32>
    %c1_284 = arith.constant 1 : index
    %c3_285 = arith.constant 3 : index
    %c0_286 = arith.constant 0 : index
    %c0_287 = arith.constant 0 : index
    %c0_288 = arith.constant 0 : index
    %280 = vector.load %arg3[%c1_284, %c3_285, %c0_286, %c0_287, %c0_288] : memref<2x4x4x1x128xf32, #tpu.memory_space<vmem>>, vector<1x1x1x1x128xf32>
    %281 = vector.shape_cast %280 : vector<1x1x1x1x128xf32> to vector<1x128xf32>
    %282 = arith.addf %275, %277 : vector<1x1x128xf32>
    %283 = vector.shape_cast %279 : vector<1x128xf32> to vector<1x1x128xf32>
    %284 = arith.mulf %283, %282 : vector<1x1x128xf32>
    %285 = arith.subf %281, %279 : vector<1x128xf32>
    %286 = vector.shape_cast %285 : vector<1x128xf32> to vector<1x1x128xf32>
    %287 = arith.mulf %275, %286 : vector<1x1x128xf32>
    %288 = arith.addf %279, %281 : vector<1x128xf32>
    %289 = vector.shape_cast %288 : vector<1x128xf32> to vector<1x1x128xf32>
    %290 = arith.mulf %277, %289 : vector<1x1x128xf32>
    %291 = arith.subf %284, %290 : vector<1x1x128xf32>
    %292 = arith.addf %273, %291 : vector<1x1x128xf32>
    %293 = arith.addf %284, %287 : vector<1x1x128xf32>
    %294 = arith.addf %273, %293 : vector<1x1x128xf32>
    %c0_289 = arith.constant 0 : index
    %c1_290 = arith.constant 1 : index
    %c0_291 = arith.constant 0 : index
    %c0_292 = arith.constant 0 : index
    %c0_293 = arith.constant 0 : index
    %295 = vector.load %arg2[%c0_289, %c1_290, %c0_291, %c0_292, %c0_293] : memref<2x4x1x1x128xf32, #tpu.memory_space<vmem>>, vector<1x1x1x1x128xf32>
    %296 = vector.shape_cast %295 : vector<1x1x1x1x128xf32> to vector<1x1x128xf32>
    %c1_294 = arith.constant 1 : index
    %c1_295 = arith.constant 1 : index
    %c0_296 = arith.constant 0 : index
    %c0_297 = arith.constant 0 : index
    %c0_298 = arith.constant 0 : index
    %297 = vector.load %arg2[%c1_294, %c1_295, %c0_296, %c0_297, %c0_298] : memref<2x4x1x1x128xf32, #tpu.memory_space<vmem>>, vector<1x1x1x1x128xf32>
    %298 = vector.shape_cast %297 : vector<1x1x1x1x128xf32> to vector<1x1x128xf32>
    %c0_299 = arith.constant 0 : index
    %c3_300 = arith.constant 3 : index
    %c1_301 = arith.constant 1 : index
    %c0_302 = arith.constant 0 : index
    %c0_303 = arith.constant 0 : index
    %299 = vector.load %arg3[%c0_299, %c3_300, %c1_301, %c0_302, %c0_303] : memref<2x4x4x1x128xf32, #tpu.memory_space<vmem>>, vector<1x1x1x1x128xf32>
    %300 = vector.shape_cast %299 : vector<1x1x1x1x128xf32> to vector<1x128xf32>
    %c1_304 = arith.constant 1 : index
    %c3_305 = arith.constant 3 : index
    %c1_306 = arith.constant 1 : index
    %c0_307 = arith.constant 0 : index
    %c0_308 = arith.constant 0 : index
    %301 = vector.load %arg3[%c1_304, %c3_305, %c1_306, %c0_307, %c0_308] : memref<2x4x4x1x128xf32, #tpu.memory_space<vmem>>, vector<1x1x1x1x128xf32>
    %302 = vector.shape_cast %301 : vector<1x1x1x1x128xf32> to vector<1x128xf32>
    %303 = arith.addf %296, %298 : vector<1x1x128xf32>
    %304 = vector.shape_cast %300 : vector<1x128xf32> to vector<1x1x128xf32>
    %305 = arith.mulf %304, %303 : vector<1x1x128xf32>
    %306 = arith.subf %302, %300 : vector<1x128xf32>
    %307 = vector.shape_cast %306 : vector<1x128xf32> to vector<1x1x128xf32>
    %308 = arith.mulf %296, %307 : vector<1x1x128xf32>
    %309 = arith.addf %300, %302 : vector<1x128xf32>
    %310 = vector.shape_cast %309 : vector<1x128xf32> to vector<1x1x128xf32>
    %311 = arith.mulf %298, %310 : vector<1x1x128xf32>
    %312 = arith.subf %305, %311 : vector<1x1x128xf32>
    %313 = arith.addf %292, %312 : vector<1x1x128xf32>
    %314 = arith.addf %305, %308 : vector<1x1x128xf32>
    %315 = arith.addf %294, %314 : vector<1x1x128xf32>
    %c0_309 = arith.constant 0 : index
    %c2_310 = arith.constant 2 : index
    %c0_311 = arith.constant 0 : index
    %c0_312 = arith.constant 0 : index
    %c0_313 = arith.constant 0 : index
    %316 = vector.load %arg2[%c0_309, %c2_310, %c0_311, %c0_312, %c0_313] : memref<2x4x1x1x128xf32, #tpu.memory_space<vmem>>, vector<1x1x1x1x128xf32>
    %317 = vector.shape_cast %316 : vector<1x1x1x1x128xf32> to vector<1x1x128xf32>
    %c1_314 = arith.constant 1 : index
    %c2_315 = arith.constant 2 : index
    %c0_316 = arith.constant 0 : index
    %c0_317 = arith.constant 0 : index
    %c0_318 = arith.constant 0 : index
    %318 = vector.load %arg2[%c1_314, %c2_315, %c0_316, %c0_317, %c0_318] : memref<2x4x1x1x128xf32, #tpu.memory_space<vmem>>, vector<1x1x1x1x128xf32>
    %319 = vector.shape_cast %318 : vector<1x1x1x1x128xf32> to vector<1x1x128xf32>
    %c0_319 = arith.constant 0 : index
    %c3_320 = arith.constant 3 : index
    %c2_321 = arith.constant 2 : index
    %c0_322 = arith.constant 0 : index
    %c0_323 = arith.constant 0 : index
    %320 = vector.load %arg3[%c0_319, %c3_320, %c2_321, %c0_322, %c0_323] : memref<2x4x4x1x128xf32, #tpu.memory_space<vmem>>, vector<1x1x1x1x128xf32>
    %321 = vector.shape_cast %320 : vector<1x1x1x1x128xf32> to vector<1x128xf32>
    %c1_324 = arith.constant 1 : index
    %c3_325 = arith.constant 3 : index
    %c2_326 = arith.constant 2 : index
    %c0_327 = arith.constant 0 : index
    %c0_328 = arith.constant 0 : index
    %322 = vector.load %arg3[%c1_324, %c3_325, %c2_326, %c0_327, %c0_328] : memref<2x4x4x1x128xf32, #tpu.memory_space<vmem>>, vector<1x1x1x1x128xf32>
    %323 = vector.shape_cast %322 : vector<1x1x1x1x128xf32> to vector<1x128xf32>
    %324 = arith.addf %317, %319 : vector<1x1x128xf32>
    %325 = vector.shape_cast %321 : vector<1x128xf32> to vector<1x1x128xf32>
    %326 = arith.mulf %325, %324 : vector<1x1x128xf32>
    %327 = arith.subf %323, %321 : vector<1x128xf32>
    %328 = vector.shape_cast %327 : vector<1x128xf32> to vector<1x1x128xf32>
    %329 = arith.mulf %317, %328 : vector<1x1x128xf32>
    %330 = arith.addf %321, %323 : vector<1x128xf32>
    %331 = vector.shape_cast %330 : vector<1x128xf32> to vector<1x1x128xf32>
    %332 = arith.mulf %319, %331 : vector<1x1x128xf32>
    %333 = arith.subf %326, %332 : vector<1x1x128xf32>
    %334 = arith.addf %313, %333 : vector<1x1x128xf32>
    %335 = arith.addf %326, %329 : vector<1x1x128xf32>
    %336 = arith.addf %315, %335 : vector<1x1x128xf32>
    %c0_329 = arith.constant 0 : index
    %c3_330 = arith.constant 3 : index
    %c0_331 = arith.constant 0 : index
    %c0_332 = arith.constant 0 : index
    %c0_333 = arith.constant 0 : index
    %337 = vector.load %arg2[%c0_329, %c3_330, %c0_331, %c0_332, %c0_333] : memref<2x4x1x1x128xf32, #tpu.memory_space<vmem>>, vector<1x1x1x1x128xf32>
    %338 = vector.shape_cast %337 : vector<1x1x1x1x128xf32> to vector<1x1x128xf32>
    %c1_334 = arith.constant 1 : index
    %c3_335 = arith.constant 3 : index
    %c0_336 = arith.constant 0 : index
    %c0_337 = arith.constant 0 : index
    %c0_338 = arith.constant 0 : index
    %339 = vector.load %arg2[%c1_334, %c3_335, %c0_336, %c0_337, %c0_338] : memref<2x4x1x1x128xf32, #tpu.memory_space<vmem>>, vector<1x1x1x1x128xf32>
    %340 = vector.shape_cast %339 : vector<1x1x1x1x128xf32> to vector<1x1x128xf32>
    %c0_339 = arith.constant 0 : index
    %c3_340 = arith.constant 3 : index
    %c3_341 = arith.constant 3 : index
    %c0_342 = arith.constant 0 : index
    %c0_343 = arith.constant 0 : index
    %341 = vector.load %arg3[%c0_339, %c3_340, %c3_341, %c0_342, %c0_343] : memref<2x4x4x1x128xf32, #tpu.memory_space<vmem>>, vector<1x1x1x1x128xf32>
    %342 = vector.shape_cast %341 : vector<1x1x1x1x128xf32> to vector<1x128xf32>
    %c1_344 = arith.constant 1 : index
    %c3_345 = arith.constant 3 : index
    %c3_346 = arith.constant 3 : index
    %c0_347 = arith.constant 0 : index
    %c0_348 = arith.constant 0 : index
    %343 = vector.load %arg3[%c1_344, %c3_345, %c3_346, %c0_347, %c0_348] : memref<2x4x4x1x128xf32, #tpu.memory_space<vmem>>, vector<1x1x1x1x128xf32>
    %344 = vector.shape_cast %343 : vector<1x1x1x1x128xf32> to vector<1x128xf32>
    %345 = arith.addf %338, %340 : vector<1x1x128xf32>
    %346 = vector.shape_cast %342 : vector<1x128xf32> to vector<1x1x128xf32>
    %347 = arith.mulf %346, %345 : vector<1x1x128xf32>
    %348 = arith.subf %344, %342 : vector<1x128xf32>
    %349 = vector.shape_cast %348 : vector<1x128xf32> to vector<1x1x128xf32>
    %350 = arith.mulf %338, %349 : vector<1x1x128xf32>
    %351 = arith.addf %342, %344 : vector<1x128xf32>
    %352 = vector.shape_cast %351 : vector<1x128xf32> to vector<1x1x128xf32>
    %353 = arith.mulf %340, %352 : vector<1x1x128xf32>
    %354 = arith.subf %347, %353 : vector<1x1x128xf32>
    %355 = arith.addf %334, %354 : vector<1x1x128xf32>
    %356 = arith.addf %347, %350 : vector<1x1x128xf32>
    %357 = arith.addf %336, %356 : vector<1x1x128xf32>
    %c0_349 = arith.constant 0 : index
    %c3_350 = arith.constant 3 : index
    %c0_351 = arith.constant 0 : index
    %c0_352 = arith.constant 0 : index
    %c0_353 = arith.constant 0 : index
    %358 = vector.load %arg4[%c0_349, %c3_350, %c0_351, %c0_352, %c0_353] : memref<2x4x1x1x128xf32, #tpu.memory_space<vmem>>, vector<1x1x1x1x128xf32>
    %359 = vector.shape_cast %358 : vector<1x1x1x1x128xf32> to vector<1x1x128xf32>
    %360 = vector.shape_cast %355 : vector<1x1x128xf32> to vector<1x1x1x1x128xf32>
    tpu.vector_store %arg4[%c0_349, %c3_350, %c0_351, %c0_352, %c0_353], %360 {strides = array<i32>} : memref<2x4x1x1x128xf32, #tpu.memory_space<vmem>>, vector<1x1x1x1x128xf32>,
    %c1_354 = arith.constant 1 : index
    %c3_355 = arith.constant 3 : index
    %c0_356 = arith.constant 0 : index
    %c0_357 = arith.constant 0 : index
    %c0_358 = arith.constant 0 : index
    %361 = vector.load %arg4[%c1_354, %c3_355, %c0_356, %c0_357, %c0_358] : memref<2x4x1x1x128xf32, #tpu.memory_space<vmem>>, vector<1x1x1x1x128xf32>
    %362 = vector.shape_cast %361 : vector<1x1x1x1x128xf32> to vector<1x1x128xf32>
    %363 = vector.shape_cast %357 : vector<1x1x128xf32> to vector<1x1x1x1x128xf32>
    tpu.vector_store %arg4[%c1_354, %c3_355, %c0_356, %c0_357, %c0_358], %363 {strides = array<i32>} : memref<2x4x1x1x128xf32, #tpu.memory_space<vmem>>, vector<1x1x1x1x128xf32>,
    return
  }
  func.func @transform_0(%arg0: i32, %arg1: i32) -> (i32, i32, i32, i32, i32) {
    %c0_i32 = arith.constant 0 : i32
    %c0_i32_0 = arith.constant 0 : i32
    %c0_i32_1 = arith.constant 0 : i32
    %c0_i32_2 = arith.constant 0 : i32
    return %c0_i32, %c0_i32_0, %arg1, %arg0, %c0_i32_1 : i32, i32, i32, i32, i32
  }
  func.func @transform_1(%arg0: i32, %arg1: i32) -> (i32, i32, i32, i32, i32) {
    %c0_i32 = arith.constant 0 : i32
    %c0_i32_0 = arith.constant 0 : i32
    %c0_i32_1 = arith.constant 0 : i32
    %c0_i32_2 = arith.constant 0 : i32
    %c0_i32_3 = arith.constant 0 : i32
    return %c0_i32, %c0_i32_0, %c0_i32_1, %arg0, %c0_i32_2 : i32, i32, i32, i32, i32
  }
  func.func @transform_2(%arg0: i32, %arg1: i32) -> (i32, i32, i32, i32, i32) {
    %c0_i32 = arith.constant 0 : i32
    %c0_i32_0 = arith.constant 0 : i32
    %c0_i32_1 = arith.constant 0 : i32
    %c0_i32_2 = arith.constant 0 : i32
    return %c0_i32, %c0_i32_0, %arg1, %arg0, %c0_i32_1 : i32, i32, i32, i32, i32
  }
}

</mosaic_0001>

<bundles_post_ra>
// kernel: custom-call
= control target key start
LH: loop header
LB: loop body
LE: loop exit
PB: predicated region body
PF: predicated region fallthrough
CT: control target
= control target key end

     0   :  { %2 = vsyncpa [#allocation0], 0  ;;  %s47_s0 = inlined_call_operand.hbm [shape: c64[4,4,4,4], index: 0, kind: input, shape index: {}]   ;;  %s48_s1 = inlined_call_operand.vmem [shape: f32[4,4,4,4], index: 1, kind: output, shape index: {}]  }
   0x1   :  { %s3_s8 = sshll.u32 %s48_s1, 4  ;;  %s4_s8 = int_to_ptr.vmem [resolvable:$true] %s3_s8 }
   0x2   :  { %s17_s9 = scalar_lea.vmem %s4_s8, 1024  ;;  %p22_p1 = scmp.lt.s32.totalorder %s4_s8, %s4_s8 }
   0x3   :  { %p18_p0 = scmp.ne.s32.totalorder %s4_s8, %s17_s9  ;;  %p23_p2 = scmp.lt.s32.totalorder %s17_s9, %s17_s9 }
   0x5   :  { %p24_p3 = por %p23_p2, %p22_p1 }
   0x7   :  { %p25_p4 = pnand %p24_p3, %p18_p0 }
   0x9   :  { %28 = shalt.err (!%p25_p4)  }
   0xa   :  { %6 = dma.hbm_to_vmem [thread:$0]  %s47_s0, 1024, %s4_s8, [#allocation0] }
   0xb   :  { %29 = dma.done.wait [#allocation0], 1024  }
   0xc   :  { %30 = vsyncadd [#allocation0], 4294966272 }
   0xd   :  { %8 = vsyncpa [#allocation0], 1 }

// kernel: custom-call.1
= control target key start
LH: loop header
LB: loop body
LE: loop exit
PB: predicated region body
PF: predicated region fallthrough
CT: control target
= control target key end

     0   :  { %s51_s0 = inlined_call_operand.hbm [shape: c64[4,4,4,4], index: 0, kind: input, shape index: {}]   ;;  %s52_s1 = inlined_call_operand.vmem [shape: f32[4,4,4,4], index: 1, kind: output, shape index: {}]  }
   0x1   :  { %s2_s8 = scalar_lea.hbm %s51_s0, 1024 }
   0x2   :  { %3 = vsyncpa [#allocation0], 0  ;;  %s4_s11 = sshll.u32 %s52_s1, 4  ;;  %s5_s11 = int_to_ptr.vmem [resolvable:$true] %s4_s11 }
   0x3   :  { %s20_s12 = scalar_lea.vmem %s5_s11, 1024  ;;  %p25_p1 = scmp.lt.s32.totalorder %s5_s11, %s5_s11 }
   0x4   :  { %p21_p0 = scmp.ne.s32.totalorder %s5_s11, %s20_s12  ;;  %p26_p2 = scmp.lt.s32.totalorder %s20_s12, %s20_s12 }
   0x6   :  { %p27_p3 = por %p26_p2, %p25_p1 }
   0x8   :  { %p28_p4 = pnand %p27_p3, %p21_p0 }
   0xa   :  { %31 = shalt.err (!%p28_p4)  }
   0xb   :  { %7 = dma.hbm_to_vmem [thread:$0]  %s2_s8, 1024, %s5_s11, [#allocation0] }
   0xc   :  { %33 = dma.done.wait [#allocation0], 1024  }
   0xd   :  { %34 = vsyncadd [#allocation0], 4294966272 }
   0xe   :  { %9 = vsyncpa [#allocation0], 1 }

// kernel: reverse.0
= control target key start
LH: loop header
LB: loop body
LE: loop exit
PB: predicated region body
PF: predicated region fallthrough
CT: control target
= control target key end

     0   :  { %v72_v3 = vlaneseq  ;;  %v65_v9 = vld [vmem:[#allocation0 + $0x7] ss:$-1 sm:$0xff]  ;;  %v79_v12 = vld [vmem:[#allocation0 + $0x17] ss:$-1 sm:$0xff]  ;;  %s331_s0 = inlined_call_operand.vmem [shape: f32[2,4,16,7], index: 0, kind: input, shape index: {}]   ;;  %s332_s1 = inlined_call_operand.vmem [shape: f32[2,4,16,7], index: 1, kind: output, shape index: {}]  }
   0x1   :  { %v45_v0 = vld [vmem:[%s331_s0] sm:$0xff]  ;;  %v47_v1 = vld [vmem:[%s331_s0 + $0x8] sm:$0xff]  ;;  %v49_v2 = vld [vmem:[%s331_s0 + $0x10] sm:$0xff]  ;;  %v66_v10 = vrot.slane %v65_v9, 1  ;;  %v80_v14 = vrot.slane %v79_v12, 1 }
   0x2   :  { %46 = vst [vmem:[#allocation0 + $0x8] sm:$0xff] %v45_v0  ;;  %48 = vst [vmem:[#allocation0 + $0x18] sm:$0xff] %v47_v1  ;;  %v51_v4 = vld [vmem:[%s331_s0 + $0x18] sm:$0xff]  ;;  %v53_v5 = vld [vmem:[%s331_s0 + $0x20] sm:$0xff]  ;;  %v73_v11 = vshrl.u32 %v72_v3, 7 }
   0x3   :  { %50 = vst [vmem:[#allocation0 + $0x28] sm:$0xff] %v49_v2  ;;  %v55_v6 = vld [vmem:[%s331_s0 + $0x28] sm:$0xff]  ;;  %52 = vst [vmem:[#allocation0 + $0x38] sm:$0xff] %v51_v4  ;;  %v57_v7 = vld [vmem:[%s331_s0 + $0x30] sm:$0xff] }
   0x4   :  { %54 = vst [vmem:[#allocation0 + $0x48] sm:$0xff] %v53_v5  ;;  %56 = vst [vmem:[#allocation0 + $0x58] sm:$0xff] %v55_v6  ;;  %v59_v8 = vld [vmem:[%s331_s0 + $0x38] sm:$0xff]  ;;  %v93_v13 = vld [vmem:[#allocation0 + $0x27] ss:$-1 sm:$0xff]  ;;  %vm74_vm0 = vcmp.lt.s32.totalorder %v73_v11, 7 }
   0x5   :  { %58 = vst [vmem:[#allocation0 + $0x68] sm:$0xff] %v57_v7  ;;  %60 = vst [vmem:[#allocation0 + $0x78] sm:$0xff] %v59_v8  ;;  %v94_v15 = vrot.slane %v93_v13, 1  ;;  %v107_v16 = vld [vmem:[#allocation0 + $0x37] ss:$-1 sm:$0xff] }
   0x6   :  { %67 = vst [vmem:[#allocation1] sm:$0xff] %v66_v10  ;;  %v108_v17 = vrot.slane %v107_v16, 1  ;;  %v121_v18 = vld [vmem:[#allocation0 + $0x47] ss:$-1 sm:$0xff]  ;;  %v135_v19 = vld [vmem:[#allocation0 + $0x57] ss:$-1 sm:$0xff] }
   0x7   :  { %81 = vst [vmem:[#allocation1 + $0x8] sm:$0xff] %v80_v14  ;;  %95 = vst [vmem:[#allocation1 + $0x10] sm:$0xff] %v94_v15  ;;  %v122_v20 = vrot.slane %v121_v18, 1  ;;  %v136_v21 = vrot.slane %v135_v19, 1  ;;  %v149_v22 = vld [vmem:[#allocation0 + $0x67] ss:$-1 sm:$0xff] }
   0x8   :  { %v163_v23 = vld [vmem:[#allocation0 + $0x77] ss:$-1 sm:$0xff]  ;;  %109 = vst [vmem:[#allocation1 + $0x18] sm:$0xff] %v108_v17  ;;  %v150_v24 = vrot.slane %v149_v22, 1 }
   0x9   :  { %v164_v25 = vrot.slane %v163_v23, 1  ;;  %v70_v26 = vld [vmem:[#allocation0 + $0xf] ss:$-1 sm:$0xff]  ;;  %v84_v27 = vld [vmem:[#allocation0 + $0x1f] ss:$-1 sm:$0xff]  ;;  %123 = vst [vmem:[#allocation1 + $0x20] sm:$0xff] %v122_v20 }
   0xa   :  { %v98_v28 = vld [vmem:[#allocation0 + $0x2f] ss:$-1 sm:$0xff]  ;;  %137 = vst [vmem:[#allocation1 + $0x28] sm:$0xff] %v136_v21  ;;  %v71_v29 = vrot.slane %v70_v26, 1  ;;  %v85_v30 = vrot.slane %v84_v27, 1  ;;  %151 = vst [vmem:[#allocation1 + $0x30] sm:$0xff] %v150_v24 }
   0xb   :  { %v99_v31 = vrot.slane %v98_v28, 1  ;;  %v112_v32 = vld [vmem:[#allocation0 + $0x3f] ss:$-1 sm:$0xff]  ;;  %165 = vst [vmem:[#allocation1 + $0x38] sm:$0xff] %v164_v25  ;;  %v126_v34 = vld [vmem:[#allocation0 + $0x4f] ss:$-1 sm:$0xff] }
   0xc   :  { %v113_v33 = vrot.slane %v112_v32, 1  ;;  %v140_v35 = vld [vmem:[#allocation0 + $0x5f] ss:$-1 sm:$0xff]  ;;  %75 = vst.msk [vmem:[#allocation1] sm:$0xff] %vm74_vm0, %v71_v29  ;;  %89 = vst.msk [vmem:[#allocation1 + $0x8] sm:$0xff] %vm74_vm0, %v85_v30  ;;  %v127_v36 = vrot.slane %v126_v34, 1 }
   0xd   :  { %103 = vst.msk [vmem:[#allocation1 + $0x10] sm:$0xff] %vm74_vm0, %v99_v31  ;;  %v141_v37 = vrot.slane %v140_v35, 1  ;;  %v154_v38 = vld [vmem:[#allocation0 + $0x6f] ss:$-1 sm:$0xff]  ;;  %v168_v39 = vld [vmem:[#allocation0 + $0x7f] ss:$-1 sm:$0xff] }
   0xe   :  { %117 = vst.msk [vmem:[#allocation1 + $0x18] sm:$0xff] %vm74_vm0, %v113_v33  ;;  %v155_v40 = vrot.slane %v154_v38, 1  ;;  %v169_v41 = vrot.slane %v168_v39, 1  ;;  %131 = vst.msk [vmem:[#allocation1 + $0x20] sm:$0xff] %vm74_vm0, %v127_v36 }
   0xf   :  { %145 = vst.msk [vmem:[#allocation1 + $0x28] sm:$0xff] %vm74_vm0, %v141_v37 }
  0x10   :  { %159 = vst.msk [vmem:[#allocation1 + $0x30] sm:$0xff] %vm74_vm0, %v155_v40  ;;  %173 = vst.msk [vmem:[#allocation1 + $0x38] sm:$0xff] %vm74_vm0, %v169_v41 }
  0x13   :  { %v216_v42 = vld [vmem:[#allocation1] sm:$0xff]  ;;  %v218_v43 = vld [vmem:[#allocation1 + $0x8] sm:$0xff] }
  0x14   :  { %v220_v44 = vld [vmem:[#allocation1 + $0x10] sm:$0xff]  ;;  %217 = vst [vmem:[%s332_s1] sm:$0xff] %v216_v42  ;;  %219 = vst [vmem:[%s332_s1 + $0x8] sm:$0xff] %v218_v43 }
  0x15   :  { %221 = vst [vmem:[%s332_s1 + $0x10] sm:$0xff] %v220_v44  ;;  %v222_v45 = vld [vmem:[#allocation1 + $0x18] sm:$0xff]  ;;  %v224_v46 = vld [vmem:[#allocation1 + $0x20] sm:$0xff] }
  0x16   :  { %223 = vst [vmem:[%s332_s1 + $0x18] sm:$0xff] %v222_v45  ;;  %v226_v47 = vld [vmem:[#allocation1 + $0x28] sm:$0xff]  ;;  %225 = vst [vmem:[%s332_s1 + $0x20] sm:$0xff] %v224_v46 }
  0x17   :  { %227 = vst [vmem:[%s332_s1 + $0x28] sm:$0xff] %v226_v47  ;;  %v228_v48 = vld [vmem:[#allocation1 + $0x30] sm:$0xff]  ;;  %v230_v49 = vld [vmem:[#allocation1 + $0x38] sm:$0xff] }
  0x18   :  { %229 = vst [vmem:[%s332_s1 + $0x30] sm:$0xff] %v228_v48  ;;  %231 = vst [vmem:[%s332_s1 + $0x38] sm:$0xff] %v230_v49 }

// kernel: spectral_conv2d.1
= control target key start
LH: loop header
LB: loop body
LE: loop exit
PB: predicated region body
PF: predicated region fallthrough
CT: control target
= control target key end

     0   :  { %s844_s9 = smov 0   ;;  %s846_s10 = smov 0   ;;  %s1094_s0 = inlined_call_operand.vmem [shape: f32[2,4,2,1,128], index: 0, kind: input, shape index: {}]   ;;  %s1095_s1 = inlined_call_operand.vmem [shape: f32[2,4,4,1,128], index: 1, kind: input, shape index: {}]   ;;  %s1096_s2 = inlined_call_operand.vmem [shape: f32[2,4,2,1,128], index: 2, kind: output, shape index: {}]  }
   0x1   :  { %s848_s11 = smov 0   ;;  %s850_s12 = smov 0  }
   0x2   :  { %s852_s13 = smov 0  }
   0x3 LB: > { %s21_s14 = sadd.s32 1, %s823_s12  ;;  %s671_s15 = sadd.s32 4294967295, %s827_s13   ;;  %s827_s13 = sphi %s852_s13, %s12_s13   ;;  %s823_s12 = sphi %s850_s12, %s1101_s12   ;;  %s819_s11 = sphi %s848_s11, %s1100_s11   ;;  %s815_s10 = sphi %s846_s10, %s1099_s10   ;;  %s811_s9 = sphi %s844_s9, %s1098_s9  }
   0x4   : > { %p22_p0 = scmp.ge.s32.totalorder %s21_s14, 2  ;;  %p40_p1 = scmp.ne.s32.totalorder %s815_s10, %s811_s9 }
   0x5   : > { %p41_p2 = scmp.eq.s32.totalorder %s827_s13, 0  ;;  %p98_p4 = scmp.eq.s32.totalorder %s671_s15, 1 }
   0x6   : > { %s1103_s14 = smov (%p22_p0, %s21_s14), 0  ;;  %s33_s17 = sadd.s32 1, %s815_s10 }
   0x7   : > { %p42_p3 = por %p41_p2, %p40_p1  ;;  %s28_s16 = ssub.s32 %s823_s12, %s1103_s14 }
   0x8   : > { %p31_p5 = scmp.eq.s32.totalorder %s28_s16, 0  ;;  %p879_p6 = por %p98_p4, %p40_p1 }
   0x9   : > { %p675_p7 = scmp.ge.s32.totalorder %s827_s13, 2 }
   0xa   : > { %s884_s19 = scalar_select %p31_p5, %s815_s10, %s33_s17  }
   0xb   : > { %126 = sbr.rel (%p675_p7) target bundleno = 24 (0x18), region = 20 }
  0x10   : > { %129 = sbr.rel (!%p42_p3) target bundleno = 24 (0x18), region = 24  ;;  %s131_s20 = sand.u32 (%p42_p3), 1, %s815_s10  }
  0x11   : > { %s135_s23 = scalar_lea.vmem (%p42_p3), %s1094_s0, %s823_s12  ;;  %s676_s24 = sshll.u32 (%p42_p3), %s131_s20, 3 }
  0x12   : > { %v152_v0 = vld [vmem:[%s135_s23] sm:$0x1] (%p42_p3)  ;;  %v154_v1 = vld [vmem:[%s135_s23 + $0x2] sm:$0x1] (%p42_p3)  ;;  %v156_v2 = vld [vmem:[%s135_s23 + $0x4] sm:$0x1] (%p42_p3) }
  0x13   : > { %v158_v3 = vld [vmem:[%s135_s23 + $0x6] sm:$0x1] (%p42_p3)  ;;  %s133_s25 = scalar_lea.vmem (%p42_p3), [#allocation2], %s676_s24  ;;  %v160_v4 = vld [vmem:[%s135_s23 + $0x8] sm:$0x1] (%p42_p3) }
  0x14   : > { %153 = vst [vmem:[%s133_s25] sm:$0x1] (%p42_p3), %v152_v0  ;;  %155 = vst [vmem:[%s133_s25 + $0x1] sm:$0x1] (%p42_p3), %v154_v1  ;;  %v162_v5 = vld [vmem:[%s135_s23 + $0xa] sm:$0x1] (%p42_p3) }
  0x15   : > { %157 = vst [vmem:[%s133_s25 + $0x2] sm:$0x1] %v156_v2  ;;  %159 = vst [vmem:[%s133_s25 + $0x3] sm:$0x1] %v158_v3  ;;  %v164_v6 = vld [vmem:[%s135_s23 + $0xc] sm:$0x1] }
  0x16   : > { %161 = vst [vmem:[%s133_s25 + $0x4] sm:$0x1] %v160_v4  ;;  %163 = vst [vmem:[%s133_s25 + $0x5] sm:$0x1] %v162_v5  ;;  %v166_v7 = vld [vmem:[%s135_s23 + $0xe] sm:$0x1] }
  0x17   : > { %165 = vst [vmem:[%s133_s25 + $0x6] sm:$0x1] %v164_v6  ;;  %167 = vst [vmem:[%s133_s25 + $0x7] sm:$0x1] %v166_v7 }
  0x18 PF: > { %p677_p8 = scmp.ge.s32.totalorder %s827_s13, 1  ;;  %p206_p9 = scmp.lt.s32.totalorder %s827_s13, 3 }
  0x1a   : > { %p207_p10 = pnand %p677_p8, %p206_p9 }
  0x1b   : > { %s213_s26 = sand.u32 (!%p207_p10), 1, %s811_s9  }
  0x1c   : > { %210 = sbr.rel (%p207_p10) target bundleno = 88 (0x58), region = 65  ;;  %s901_s3 = sshll.u32 (!%p207_p10), %s213_s26, 3 }
  0x1d   : > { %s916_s17 = scalar_lea.vmem (!%p207_p10), [#allocation2], %s901_s3  ;;  %s991_s25 = scalar_lea.vmem (!%p207_p10), [#allocation3], %s901_s3 }
  0x21   : > { %v242_v8 = vld [vmem:[%s1095_s1] sm:$0x1]  ;;  %v681_v9 = vld [vmem:[%s1095_s1 + $0x10] sm:$0x1]  ;;  %v684_v11 = vld [vmem:[%s1095_s1 + $0x1] sm:$0x1]  ;;  %s524_s8 = scalar_lea.vmem (%p879_p6), %s1096_s2, %s819_s11 }
  0x22   : > { %v249_v10 = vadd.f32 %v681_v9, %v242_v8  ;;  %v685_v12 = vld [vmem:[%s1095_s1 + $0x11] sm:$0x1]  ;;  %v247_v13 = vsub.f32 %v681_v9, %v242_v8  ;;  %v688_v15 = vld [vmem:[%s1095_s1 + $0x2] sm:$0x1]  ;;  %v689_v16 = vld [vmem:[%s1095_s1 + $0x12] sm:$0x1] }
  0x23   : > { %v267_v14 = vadd.f32 %v685_v12, %v684_v11  ;;  %v265_v17 = vsub.f32 %v685_v12, %v684_v11  ;;  %v239_v18 = vld [vmem:[%s916_s17] sm:$0x1]  ;;  %v680_v19 = vld [vmem:[%s916_s17 + $0x4] sm:$0x1]  ;;  %v682_v20 = vld [vmem:[%s916_s17 + $0x1] sm:$0x1]  ;;  %v285_v21 = vadd.f32 %v689_v16, %v688_v15  ;;  %v283_v22 = vsub.f32 %v689_v16, %v688_v15 }
  0x24   : > { %v245_v23 = vadd.f32 %v680_v19, %v239_v18  ;;  %v250_v24 = vmul.f32 %v680_v19, %v249_v10  ;;  %v683_v25 = vld [vmem:[%s916_s17 + $0x5] sm:$0x1]  ;;  %v686_v26 = vld [vmem:[%s916_s17 + $0x2] sm:$0x1]  ;;  %v687_v27 = vld [vmem:[%s916_s17 + $0x6] sm:$0x1]  ;;  %v248_v28 = vmul.f32 %v247_v13, %v239_v18 }
  0x25   : > { %v266_v29 = vmul.f32 %v682_v20, %v265_v17  ;;  %v263_v30 = vadd.f32 %v683_v25, %v682_v20  ;;  %v268_v31 = vmul.f32 %v683_v25, %v267_v14  ;;  %v281_v32 = vadd.f32 %v687_v27, %v686_v26  ;;  %v690_v34 = vld [vmem:[%s916_s17 + $0x3] sm:$0x1]  ;;  %v691_v35 = vld [vmem:[%s916_s17 + $0x7] sm:$0x1]  ;;  %v693_v38 = vld [vmem:[%s1095_s1 + $0x13] sm:$0x1] }
  0x26   : > { %v286_v33 = vmul.f32 %v687_v27, %v285_v21  ;;  %v692_v36 = vld [vmem:[%s1095_s1 + $0x3] sm:$0x1]  ;;  %v246_v37 = vmul.f32 %v245_v23, %v242_v8  ;;  %v299_v39 = vadd.f32 %v691_v35, %v690_v34  ;;  %v284_v40 = vmul.f32 %v686_v26, %v283_v22  ;;  %v933_v41 = vld [vmem:[%s916_s17] sm:$0x1]  ;;  %v695_v42 = vld [vmem:[%s916_s17 + $0x4] sm:$0x1] }
  0x27   : > { %v264_v43 = vmul.f32 %v684_v11, %v263_v30  ;;  %v282_v44 = vmul.f32 %v688_v15, %v281_v32  ;;  %v303_v45 = vadd.f32 %v693_v38, %v692_v36  ;;  %v301_v46 = vsub.f32 %v693_v38, %v692_v36  ;;  %v939_v47 = vld [vmem:[%s1095_s1 + $0x4] sm:$0x1]  ;;  %v944_v48 = vld [vmem:[%s1095_s1 + $0x14] sm:$0x1]  ;;  %v698_v53 = vld [vmem:[%s916_s17 + $0x1] sm:$0x1] }
  0x28   : > { %v251_v49 = vsub.f32 %v246_v37, %v250_v24  ;;  %v300_v50 = vmul.f32 %v692_v36, %v299_v39  ;;  %v253_v51 = vadd.f32 %v248_v28, %v246_v37  ;;  %v318_v52 = vadd.f32 %v695_v42, %v933_v41  ;;  %v699_v54 = vld [vmem:[%s916_s17 + $0x5] sm:$0x1]  ;;  %v701_v60 = vld [vmem:[%s1095_s1 + $0x15] sm:$0x1]  ;;  %v702_v61 = vld [vmem:[%s916_s17 + $0x2] sm:$0x1] }
  0x29   : > { %v700_v55 = vld [vmem:[%s1095_s1 + $0x5] sm:$0x1]  ;;  %v269_v56 = vsub.f32 %v264_v43, %v268_v31  ;;  %v287_v57 = vsub.f32 %v282_v44, %v286_v33  ;;  %v304_v58 = vmul.f32 %v691_v35, %v303_v45  ;;  %v271_v59 = vadd.f32 %v266_v29, %v264_v43  ;;  %v703_v62 = vld [vmem:[%s916_s17 + $0x6] sm:$0x1]  ;;  %v705_v4 = vld [vmem:[%s1095_s1 + $0x16] sm:$0x1] }
  0x2a   : > { %v289_v63 = vadd.f32 %v284_v40, %v282_v44  ;;  %v302_v0 = vmul.f32 %v690_v34, %v301_v46  ;;  %v319_v1 = vmul.f32 %v939_v47, %v318_v52  ;;  %v322_v2 = vadd.f32 %v944_v48, %v939_v47  ;;  %v704_v3 = vld [vmem:[%s1095_s1 + $0x6] sm:$0x1]  ;;  %v706_v9 = vld [vmem:[%s916_s17 + $0x3] sm:$0x1]  ;;  %v707_v10 = vld [vmem:[%s916_s17 + $0x7] sm:$0x1] }
  0x2b   : > { %v270_v5 = vadd.f32 %v269_v56, %v251_v49  ;;  %v305_v6 = vsub.f32 %v300_v50, %v304_v58  ;;  %v272_v7 = vadd.f32 %v271_v59, %v253_v51  ;;  %v334_v8 = vadd.f32 %v699_v54, %v698_v53  ;;  %v708_v15 = vld [vmem:[%s1095_s1 + $0x7] sm:$0x1]  ;;  %v709_v16 = vld [vmem:[%s1095_s1 + $0x17] sm:$0x1]  ;;  %v975_v29 = vld [vmem:[%s916_s17] sm:$0x1] }
  0x2c   : > { %v307_v11 = vadd.f32 %v302_v0, %v300_v50  ;;  %v323_v12 = vmul.f32 %v695_v42, %v322_v2  ;;  %v338_v13 = vadd.f32 %v701_v60, %v700_v55  ;;  %v350_v14 = vadd.f32 %v703_v62, %v702_v61  ;;  %v712_v30 = vld [vmem:[%s916_s17 + $0x4] sm:$0x1]  ;;  %v983_v35 = vld [vmem:[%s1095_s1 + $0x8] sm:$0x1]  ;;  %v988_v36 = vld [vmem:[%s1095_s1 + $0x18] sm:$0x1] }
  0x2d   : > { %v288_v17 = vadd.f32 %v287_v57, %v270_v5  ;;  %v290_v18 = vadd.f32 %v289_v63, %v272_v7  ;;  %v335_v19 = vmul.f32 %v700_v55, %v334_v8  ;;  %v354_v20 = vadd.f32 %v705_v4, %v704_v3  ;;  %v715_v42 = vld [vmem:[%s916_s17 + $0x1] sm:$0x1]  ;;  %v718_v49 = vld [vmem:[%s1095_s1 + $0x19] sm:$0x1] }
  0x2e   : > { %v324_v21 = vsub.f32 %v319_v1, %v323_v12  ;;  %v339_v22 = vmul.f32 %v699_v54, %v338_v13  ;;  %v351_v23 = vmul.f32 %v704_v3, %v350_v14  ;;  %v366_v24 = vadd.f32 %v707_v10, %v706_v9  ;;  %v720_v54 = vld [vmem:[%s916_s17 + $0x6] sm:$0x1] }
  0x2f   : > { %v306_v25 = vadd.f32 %v305_v6, %v288_v17  ;;  %v308_v26 = vadd.f32 %v307_v11, %v290_v18  ;;  %v355_v27 = vmul.f32 %v703_v62, %v354_v20  ;;  %v370_v28 = vadd.f32 %v709_v16, %v708_v15  ;;  %v724_v62 = vld [vmem:[%s916_s17 + $0x7] sm:$0x1] }
  0x30   : > { %v340_v31 = vsub.f32 %v335_v19, %v339_v22  ;;  %v367_v32 = vmul.f32 %v708_v15, %v366_v24  ;;  %v320_v33 = vsub.f32 %v944_v48, %v939_v47  ;;  %v336_v34 = vsub.f32 %v701_v60, %v700_v55  ;;  %v716_v47 = vld [vmem:[%s916_s17 + $0x5] sm:$0x1]  ;;  %v717_v48 = vld [vmem:[%s1095_s1 + $0x9] sm:$0x1]  ;;  %v721_v55 = vld [vmem:[%s1095_s1 + $0xa] sm:$0x1] }
  0x31   : > { %309 = vst [vmem:[%s991_s25] sm:$0x1] %v306_v25  ;;  %694 = vst [vmem:[%s991_s25 + $0x4] sm:$0x1] %v308_v26  ;;  %v356_v37 = vsub.f32 %v351_v23, %v355_v27  ;;  %v371_v38 = vmul.f32 %v707_v10, %v370_v28  ;;  %v352_v39 = vsub.f32 %v705_v4, %v704_v3  ;;  %v722_v60 = vld [vmem:[%s1095_s1 + $0x1a] sm:$0x1] }
  0x32   : > { %v368_v40 = vsub.f32 %v709_v16, %v708_v15  ;;  %v341_v43 = vadd.f32 %v340_v31, %v324_v21  ;;  %v321_v44 = vmul.f32 %v320_v33, %v933_v41  ;;  %v337_v45 = vmul.f32 %v698_v53, %v336_v34  ;;  %v719_v53 = vld [vmem:[%s916_s17 + $0x2] sm:$0x1]  ;;  %v725_v4 = vld [vmem:[%s1095_s1 + $0xb] sm:$0x1]  ;;  %v448_v21 = vld [vmem:[%s916_s17] sm:$0x1] }
  0x33   : > { %v386_v46 = vadd.f32 %v712_v30, %v975_v29  ;;  %v372_v50 = vsub.f32 %v367_v32, %v371_v38  ;;  %v353_v51 = vmul.f32 %v702_v61, %v352_v39  ;;  %v390_v41 = vadd.f32 %v988_v36, %v983_v35  ;;  %v723_v61 = vld [vmem:[%s916_s17 + $0x3] sm:$0x1]  ;;  %v729_v22 = vld [vmem:[%s916_s17 + $0x4] sm:$0x1]  ;;  %v731_v28 = vld [vmem:[%s1095_s1 + $0x1c] sm:$0x1] }
  0x34   : > { %v369_v52 = vmul.f32 %v706_v9, %v368_v40  ;;  %v357_v56 = vadd.f32 %v356_v37, %v341_v43  ;;  %v326_v57 = vadd.f32 %v321_v44, %v319_v1  ;;  %v342_v58 = vadd.f32 %v337_v45, %v335_v19  ;;  %v726_v1 = vld [vmem:[%s1095_s1 + $0x1b] sm:$0x1]  ;;  %v730_v27 = vld [vmem:[%s1095_s1 + $0xc] sm:$0x1]  ;;  %v732_v34 = vld [vmem:[%s916_s17 + $0x1] sm:$0x1] }
  0x35   : > { %v387_v59 = vmul.f32 %v983_v35, %v386_v46  ;;  %v358_v63 = vadd.f32 %v353_v51, %v351_v23  ;;  %v391_v2 = vmul.f32 %v712_v30, %v390_v41  ;;  %v402_v3 = vadd.f32 %v716_v47, %v715_v42  ;;  %v734_v40 = vld [vmem:[%s1095_s1 + $0xd] sm:$0x1] }
  0x36   : > { %v374_v0 = vadd.f32 %v369_v52, %v367_v32  ;;  %v373_v5 = vadd.f32 %v372_v50, %v357_v56  ;;  %v343_v6 = vadd.f32 %v342_v58, %v326_v57  ;;  %v406_v7 = vadd.f32 %v718_v49, %v717_v48 }
  0x37   : > { %v418_v8 = vadd.f32 %v720_v54, %v719_v53  ;;  %v392_v9 = vsub.f32 %v387_v59, %v391_v2  ;;  %v403_v10 = vmul.f32 %v717_v48, %v402_v3  ;;  %v422_v11 = vadd.f32 %v722_v60, %v721_v55 }
  0x38   : > { %v434_v12 = vadd.f32 %v724_v62, %v723_v61  ;;  %710 = vst [vmem:[%s991_s25 + $0x1] sm:$0x1] %v373_v5  ;;  %v359_v13 = vadd.f32 %v358_v63, %v343_v6  ;;  %v407_v14 = vmul.f32 %v716_v47, %v406_v7  ;;  %v438_v16 = vadd.f32 %v726_v1, %v725_v4  ;;  %v737_v47 = vld [vmem:[%s916_s17 + $0x6] sm:$0x1] }
  0x39   : > { %v419_v15 = vmul.f32 %v721_v55, %v418_v8  ;;  %v423_v17 = vmul.f32 %v720_v54, %v422_v11  ;;  %v388_v19 = vsub.f32 %v988_v36, %v983_v35  ;;  %v404_v20 = vsub.f32 %v718_v49, %v717_v48  ;;  %v733_v35 = vld [vmem:[%s916_s17 + $0x5] sm:$0x1]  ;;  %v738_v48 = vld [vmem:[%s1095_s1 + $0xe] sm:$0x1]  ;;  %v739_v49 = vld [vmem:[%s1095_s1 + $0x1e] sm:$0x1] }
  0x3a   : > { %v435_v18 = vmul.f32 %v725_v4, %v434_v12  ;;  %v375_v23 = vadd.f32 %v374_v0, %v359_v13  ;;  %v408_v24 = vsub.f32 %v403_v10, %v407_v14  ;;  %v439_v25 = vmul.f32 %v724_v62, %v438_v16  ;;  %v741_v54 = vld [vmem:[%s916_s17 + $0x7] sm:$0x1] }
  0x3b   : > { %v420_v26 = vsub.f32 %v722_v60, %v721_v55  ;;  %v424_v30 = vsub.f32 %v419_v15, %v423_v17  ;;  %v389_v31 = vmul.f32 %v388_v19, %v975_v29  ;;  %v405_v32 = vmul.f32 %v715_v42, %v404_v20  ;;  %v735_v29 = vld [vmem:[%s1095_s1 + $0x1d] sm:$0x1]  ;;  %v736_v42 = vld [vmem:[%s916_s17 + $0x2] sm:$0x1]  ;;  %v743_v60 = vld [vmem:[%s1095_s1 + $0x1f] sm:$0x1] }
  0x3c   : > { %v436_v33 = vsub.f32 %v726_v1, %v725_v4  ;;  %711 = vst [vmem:[%s991_s25 + $0x5] sm:$0x1] %v375_v23  ;;  %v409_v36 = vadd.f32 %v408_v24, %v392_v9  ;;  %v440_v37 = vsub.f32 %v435_v18, %v439_v25  ;;  %v454_v39 = vadd.f32 %v729_v22, %v448_v21 }
  0x3d   : > { %v421_v38 = vmul.f32 %v719_v53, %v420_v26  ;;  %v394_v43 = vadd.f32 %v389_v31, %v387_v59  ;;  %v410_v44 = vadd.f32 %v405_v32, %v403_v10  ;;  %v458_v46 = vadd.f32 %v731_v28, %v730_v27  ;;  %v740_v53 = vld [vmem:[%s916_s17 + $0x3] sm:$0x1]  ;;  %v742_v59 = vld [vmem:[%s1095_s1 + $0xf] sm:$0x1] }
  0x3e   : > { %v437_v45 = vmul.f32 %v723_v61, %v436_v33  ;;  %v425_v50 = vadd.f32 %v424_v30, %v409_v36  ;;  %v455_v52 = vmul.f32 %v730_v27, %v454_v39  ;;  %v470_v41 = vadd.f32 %v733_v35, %v732_v34  ;;  %v541_v33 = vld [vmem:[%s991_s25] sm:$0x1] (%p879_p6) }
  0x3f   : > { %v426_v51 = vadd.f32 %v421_v38, %v419_v15  ;;  %v411_v55 = vadd.f32 %v410_v44, %v394_v43  ;;  %v459_v57 = vmul.f32 %v729_v22, %v458_v46  ;;  %v474_v58 = vadd.f32 %v735_v29, %v734_v40  ;;  %542 = vst [vmem:[%s524_s8] sm:$0x1] (%p879_p6), %v541_v33 }
  0x40   : > { %v442_v56 = vadd.f32 %v437_v45, %v435_v18  ;;  %v441_v61 = vadd.f32 %v440_v37, %v425_v50  ;;  %v471_v62 = vmul.f32 %v734_v40, %v470_v41  ;;  %v486_v63 = vadd.f32 %v737_v47, %v736_v42  ;;  %v549_v37 = vld [vmem:[%s991_s25 + $0x4] sm:$0x1] (%p879_p6) }
  0x41   : > { %v490_v0 = vadd.f32 %v739_v49, %v738_v48  ;;  %v427_v2 = vadd.f32 %v426_v51, %v411_v55  ;;  %v460_v3 = vsub.f32 %v455_v52, %v459_v57  ;;  %v475_v4 = vmul.f32 %v733_v35, %v474_v58  ;;  %550 = vst [vmem:[%s524_s8 + $0x8] sm:$0x1] (%p879_p6), %v549_v37 }
  0x42   : > { %v502_v1 = vadd.f32 %v741_v54, %v740_v53  ;;  %727 = vst [vmem:[%s991_s25 + $0x2] sm:$0x1] %v441_v61  ;;  %v487_v5 = vmul.f32 %v738_v48, %v486_v63  ;;  %v506_v7 = vadd.f32 %v743_v60, %v742_v59  ;;  %v456_v8 = vsub.f32 %v731_v28, %v730_v27 }
  0x43   : > { %v491_v6 = vmul.f32 %v737_v47, %v490_v0  ;;  %v443_v9 = vadd.f32 %v442_v56, %v427_v2  ;;  %v476_v10 = vsub.f32 %v471_v62, %v475_v4  ;;  %v472_v12 = vsub.f32 %v735_v29, %v734_v40  ;;  %v551_v38 = vld [vmem:[%s991_s25 + $0x5] sm:$0x1] (%p879_p6) }
  0x44   : > { %v503_v11 = vmul.f32 %v742_v59, %v502_v1  ;;  %v507_v14 = vmul.f32 %v741_v54, %v506_v7  ;;  %v457_v15 = vmul.f32 %v456_v8, %v448_v21  ;;  %v488_v16 = vsub.f32 %v739_v49, %v738_v48  ;;  %552 = vst [vmem:[%s524_s8 + $0xa] sm:$0x1] (%p879_p6), %v551_v38 }
  0x45   : > { %v492_v13 = vsub.f32 %v487_v5, %v491_v6  ;;  %728 = vst [vmem:[%s991_s25 + $0x6] sm:$0x1] %v443_v9  ;;  %v477_v17 = vadd.f32 %v476_v10, %v460_v3  ;;  %v473_v18 = vmul.f32 %v732_v34, %v472_v12  ;;  %v504_v19 = vsub.f32 %v743_v60, %v742_v59  ;;  %v543_v34 = vld [vmem:[%s991_s25 + $0x1] sm:$0x1] (%p879_p6) }
  0x46   : > { %v508_v20 = vsub.f32 %v503_v11, %v507_v14  ;;  %v462_v22 = vadd.f32 %v457_v15, %v455_v52  ;;  %v489_v23 = vmul.f32 %v736_v42, %v488_v16  ;;  %544 = vst [vmem:[%s524_s8 + $0x2] sm:$0x1] (%p879_p6), %v543_v34 }
  0x47   : > { %v493_v24 = vadd.f32 %v492_v13, %v477_v17  ;;  %v478_v25 = vadd.f32 %v473_v18, %v471_v62  ;;  %v505_v26 = vmul.f32 %v740_v53, %v504_v19 }
  0x48   : > { %v494_v27 = vadd.f32 %v489_v23, %v487_v5 }
  0x49   : > { %v509_v28 = vadd.f32 %v508_v20, %v493_v24  ;;  %v479_v30 = vadd.f32 %v478_v25, %v462_v22  ;;  %v510_v31 = vadd.f32 %v505_v26, %v503_v11  ;;  %v545_v35 = vld [vmem:[%s991_s25 + $0x2] sm:$0x1] (%p879_p6) }
  0x4a   : > { %546 = vst [vmem:[%s524_s8 + $0x4] sm:$0x1] (%p879_p6), %v545_v35 }
  0x4b   : > { %744 = vst [vmem:[%s991_s25 + $0x3] sm:$0x1] %v509_v28  ;;  %v495_v32 = vadd.f32 %v494_v27, %v479_v30  ;;  %522 = sbr.rel (!%p879_p6) target bundleno = 88 (0x58), region = 73 }
  0x4c   : > { %v553_v39 = vld [vmem:[%s991_s25 + $0x6] sm:$0x1] (%p879_p6) }
  0x4d   : > { %v511_v21 = vadd.f32 %v510_v31, %v495_v32  ;;  %554 = vst [vmem:[%s524_s8 + $0xc] sm:$0x1] (%p879_p6), %v553_v39 }
  0x4f   : > { %745 = vst [vmem:[%s991_s25 + $0x7] sm:$0x1] %v511_v21 }
  0x52   : > { %v547_v36 = vld [vmem:[%s991_s25 + $0x3] sm:$0x1] }
  0x53   : > { %548 = vst [vmem:[%s524_s8 + $0x6] sm:$0x1] %v547_v36 }
  0x56   : > { %v555_v40 = vld [vmem:[%s991_s25 + $0x7] sm:$0x1] }
  0x57   : > { %556 = vst [vmem:[%s524_s8 + $0xe] sm:$0x1] %v555_v40 }
  0x58 PF: > { %s12_s13 = sadd.s32 1, %s827_s13   ;;  %s1098_s9 = smov %s815_s10 }
  0x59   : > { %p9_p11 = scmp.ge.s32.totalorder %s12_s13, 4   ;;  %s1099_s10 = smov %s884_s19 }
  0x5a   : > { %s1100_s11 = smov %s823_s12  ;;  %s1101_s12 = smov %s1103_s14 }
  0x5b   :  { %11 = sbr.rel (!%p9_p11) target bundleno = 3 (0x3), region = 193 }

</bundles_post_ra>
